<compile_context>
chip_gen: v5e
topology: v5e:2x2
jax: 0.10.0
libtpu: 0.0.40
codegen_flags: <defaults>
</compile_context>

<pallas_src>
import functools

import numpy as np
import jax
import jax.numpy as jnp
from jax import lax
from jax.experimental import pallas as pl
from jax.experimental.pallas import tpu as pltpu

_EPS = 1e-16
_LANES = 128


def _loss_kernel(an_ref, p_ref, t_ref, out_ref, acc_ref, *,
                 n_rows_valid, n_cls, rows, inv_off):
    a_i = pl.program_id(0)          # anchor index (outer grid axis)
    t_i = pl.program_id(1)          # row-tile index within this anchor
    n_a = pl.num_programs(0)
    n_t = pl.num_programs(1)

    @pl.when(jnp.logical_and(a_i == 0, t_i == 0))
    def _init():
        acc_ref[...] = jnp.zeros_like(acc_ref)

    # ---- validity mask for the padded tail of this anchor's row range ----
    sub = lax.broadcasted_iota(jnp.int32, (rows, _LANES), 0)
    lane = lax.broadcasted_iota(jnp.int32, (rows, _LANES), 1)
    row = (t_i * rows + sub) * _LANES + lane
    validf = (row < n_rows_valid).astype(jnp.float32)

    # ---- per-tile anchor scalars straight from SMEM (no HBM anchor stream) ----
    a_w = an_ref[2 * a_i]
    a_h = an_ref[2 * a_i + 1]
    inv_a_w = an_ref[inv_off + 2 * a_i]
    inv_a_h = an_ref[inv_off + 2 * a_i + 1]

    # feature planes, each (rows, 128)
    p0 = p_ref[0, 0]
    t0 = t_ref[0, 0]
    t1 = t_ref[1, 0]

    objf = (t0 == 1.0).astype(jnp.float32) * validf
    noobjf = (t1 == 0.0).astype(jnp.float32) * validf

    # ---- no-object BCE-with-logits; exp(-|x|) reused for sigmoid(x) ----
    e0 = jnp.exp(-jnp.abs(p0))
    bce = jnp.maximum(p0, 0.0) - p0 * t0 + jnp.log(1.0 + e0)
    r0 = pl.reciprocal(1.0 + e0, approx=True)
    sig0 = jnp.where(p0 >= 0.0, r0, e0 * r0)

    # ---- decoded boxes + midpoint IoU ----
    def sigmoid(z):
        return pl.reciprocal(1.0 + jnp.exp(-z), approx=True)

    px, py, pw, ph = p_ref[1, 0], p_ref[2, 0], p_ref[3, 0], p_ref[4, 0]
    tx, ty, tw, th = t_ref[1, 0], t_ref[2, 0], t_ref[3, 0], t_ref[4, 0]

    sx, sy = sigmoid(px), sigmoid(py)
    bw = jnp.exp(pw) * a_w
    bh = jnp.exp(ph) * a_h

    hbw, hbh = 0.5 * bw, 0.5 * bh
    htw, hth = 0.5 * tw, 0.5 * th
    b1x1, b1x2 = sx - hbw, sx + hbw
    b1y1, b1y2 = sy - hbh, sy + hbh
    b2x1, b2x2 = tx - htw, tx + htw
    b2y1, b2y2 = ty - hth, ty + hth

    iw = jnp.maximum(jnp.minimum(b1x2, b2x2) - jnp.maximum(b1x1, b2x1), 0.0)
    ih = jnp.maximum(jnp.minimum(b1y2, b2y2) - jnp.maximum(b1y1, b2y1), 0.0)
    inter = iw * ih
    area1 = jnp.abs((b1x2 - b1x1) * (b1y2 - b1y1))
    area2 = jnp.abs((b2x2 - b2x1) * (b2y2 - b2y1))
    ious = inter * pl.reciprocal(area1 + area2 - inter + 1e-6, approx=True)

    # ---- objectness MSE ----
    d_obj = sig0 - ious * t0
    obj_se = d_obj * d_obj

    # ---- box MSE: pred xy sigmoided, target wh log-transformed ----
    lw = jnp.log(_EPS + tw * inv_a_w)
    lh = jnp.log(_EPS + th * inv_a_h)
    dx, dy = sx - tx, sy - ty
    dw, dh = pw - lw, ph - lh
    box_se = dx * dx + dy * dy + dw * dw + dh * dh

    # ---- soft-target cross-entropy over the C class planes (elementwise) ----
    mx = p_ref[5, 0]
    for c in range(1, n_cls):
        mx = jnp.maximum(mx, p_ref[5 + c, 0])
    ssum = jnp.exp(p_ref[5, 0] - mx)
    for c in range(1, n_cls):
        ssum = ssum + jnp.exp(p_ref[5 + c, 0] - mx)
    lse = mx + jnp.log(ssum)
    ce = t_ref[5, 0] * (lse - p_ref[5, 0])
    for c in range(1, n_cls):
        ce = ce + t_ref[5 + c, 0] * (lse - p_ref[5 + c, 0])

    # ---- per-lane partial sums; cross-lane reduce deferred to the epilogue ----
    acc_ref[0] += bce * noobjf
    acc_ref[1] += noobjf
    acc_ref[2] += obj_se * objf
    acc_ref[3] += objf
    acc_ref[4] += box_se * objf
    acc_ref[5] += ce * objf

    @pl.when(jnp.logical_and(a_i == n_a - 1, t_i == n_t - 1))
    def _fin():
        for k in range(6):
            out_ref[k] = jnp.sum(acc_ref[k])


@functools.partial(jax.jit, static_argnames=("rows_per_tile",))
def yolo_loss_pallas(preds, target, anchors, rows_per_tile=64):
    B, A, S1, S2, F = preds.shape
    assert A == 3, "module assumes 3 anchors per scale"
    n_cls = F - 5
    SS = S1 * S2
    n_rows = B * SS                       # rows per anchor

    # tile geometry: rows (sublane) axis multiple of 8, 128 lanes per sublane
    sub = -(-n_rows // _LANES)
    rows = min(rows_per_tile, -(-sub // 8) * 8)
    rows = max(8, rows - rows % 8)
    sub_pad = -(-sub // rows) * rows
    m_pad = sub_pad * _LANES
    num_tiles = sub_pad // rows

    # per-feature, anchor-outermost, lane-dense planes: (F, A, sub_pad, 128)
    def to_planes(x):
        x = jnp.transpose(x.astype(jnp.float32), (4, 1, 0, 2, 3))
        x = x.reshape(F, A, n_rows)
        x = jnp.pad(x, ((0, 0), (0, 0), (0, m_pad - n_rows)))
        return x.reshape(F, A, sub_pad, _LANES)

    p_planes = to_planes(preds)
    t_planes = to_planes(target)

    # anchor table (w,h pairs followed by their reciprocals) lives in SMEM
    a = anchors.astype(jnp.float32).reshape(A, 2)
    an_tbl = jnp.concatenate([a.reshape(-1), (1.0 / a).reshape(-1)])   # (4A,)

    kernel = functools.partial(
        _loss_kernel, n_rows_valid=n_rows, n_cls=n_cls, rows=rows, inv_off=2 * A)

    sums = pl.pallas_call(
        kernel,
        out_shape=jax.ShapeDtypeStruct((6,), jnp.float32),
        grid_spec=pltpu.PrefetchScalarGridSpec(
            num_scalar_prefetch=0,
            grid=(A, num_tiles),
            in_specs=[
                pl.BlockSpec(memory_space=pltpu.MemorySpace.SMEM),     # anchors
                pl.BlockSpec((F, 1, rows, _LANES), lambda a_i, i: (0, a_i, i, 0)),
                pl.BlockSpec((F, 1, rows, _LANES), lambda a_i, i: (0, a_i, i, 0)),
            ],
            out_specs=pl.BlockSpec(memory_space=pltpu.MemorySpace.SMEM),
            scratch_shapes=[pltpu.VMEM((6, rows, _LANES), jnp.float32)],
        ),
        compiler_params=pltpu.CompilerParams(
            dimension_semantics=("arbitrary", "arbitrary")),
    )(an_tbl, p_planes, t_planes)

    obj_cnt = jnp.maximum(sums[3], 1.0)
    noobj_loss = sums[0] / jnp.maximum(sums[1], 1.0)   # BCE mean over no-obj cells
    obj_loss = sums[2] / obj_cnt                       # MSE mean over obj cells
    box_loss = sums[4] / (4.0 * obj_cnt)               # MSE mean over obj cells * 4 coords
    cls_loss = sums[5] / obj_cnt                       # CE mean over obj cells
    # lambda_box=10, lambda_obj=1, lambda_noobj=10, lambda_class=1
    return 10.0 * box_loss + 1.0 * obj_loss + 10.0 * noobj_loss + 1.0 * cls_loss


def _numpy_reference(preds, target, anchors):
    """Pure-numpy replica of the PyTorch Loss.forward (float64)."""
    p = np.asarray(preds, dtype=np.float64)
    t = np.asarray(target, dtype=np.float64)
    an = np.asarray(anchors, dtype=np.float64).reshape(1, 3, 1, 1, 2)
    sigmoid = lambda z: 1.0 / (1.0 + np.exp(-z))
    obj = t[..., 0] == 1
    noobj = t[..., 1] == 0

    x = p[..., 0:1][noobj]
    y = t[..., 0:1][noobj]
    noobj_loss = (np.maximum(x, 0) - x * y + np.log1p(np.exp(-np.abs(x)))).mean()

    box_preds = np.concatenate(
        [sigmoid(p[..., 1:3]), np.exp(p[..., 3:5]) * an], axis=-1)
    bp = box_preds[obj]
    tb = t[..., 1:5][obj]
    b1x1 = bp[..., 0:1] - bp[..., 2:3] / 2
    b1y1 = bp[..., 1:2] - bp[..., 3:4] / 2
    b1x2 = bp[..., 0:1] + bp[..., 2:3] / 2
    b1y2 = bp[..., 1:2] + bp[..., 3:4] / 2
    b2x1 = tb[..., 0:1] - tb[..., 2:3] / 2
    b2y1 = tb[..., 1:2] - tb[..., 3:4] / 2
    b2x2 = tb[..., 0:1] + tb[..., 2:3] / 2
    b2y2 = tb[..., 1:2] + tb[..., 3:4] / 2
    inter = (np.clip(np.minimum(b1x2, b2x2) - np.maximum(b1x1, b2x1), 0, None)
             * np.clip(np.minimum(b1y2, b2y2) - np.maximum(b1y1, b2y1), 0, None))
    a1 = np.abs((b1x2 - b1x1) * (b1y2 - b1y1))
    a2 = np.abs((b2x2 - b2x1) * (b2y2 - b2y1))
    ious = inter / (a1 + a2 - inter + 1e-6)

    obj_loss = ((sigmoid(p[..., 0:1][obj]) - ious * t[..., 0:1][obj]) ** 2).mean()

    p2 = p.copy()
    p2[..., 1:3] = sigmoid(p[..., 1:3])
    t2 = t.copy()
    t2[..., 3:5] = np.log(1e-16 + t[..., 3:5] / an)
    box_loss = ((p2[..., 1:5][obj] - t2[..., 1:5][obj]) ** 2).mean()

    logits = p[..., 5:][obj]
    tgt = t[..., 5:][obj]
    m = logits.max(axis=-1, keepdims=True)
    logp = logits - (m + np.log(np.exp(logits - m).sum(axis=-1, keepdims=True)))
    cls_loss = (-(tgt * logp).sum(axis=-1)).mean()

    return 10.0 * box_loss + obj_loss + 10.0 * noobj_loss + cls_loss


if __name__ == "__main__":
    B, A, S, C = 2, 3, 8, 11
    F = 5 + C  # 16

    key = jax.random.PRNGKey(0)
    k1, k2, k3, k4, k5 = jax.random.split(key, 5)
    preds = (0.5 * jax.random.normal(k1, (B, A, S, S, F))).astype(jnp.float32)
    obj_mask = jax.random.bernoulli(k2, 0.3, (B, A, S, S)).astype(jnp.float32)
    xy = jax.random.uniform(k3, (B, A, S, S, 2), minval=0.05, maxval=0.95)
    wh = jax.random.uniform(k4, (B, A, S, S, 2), minval=0.1, maxval=1.5)
    cls_idx = jax.random.randint(k5, (B, A, S, S), 0, C)
    cls_onehot = jax.nn.one_hot(cls_idx, C, dtype=jnp.float32)
    target = jnp.concatenate(
        [obj_mask[..., None], xy, wh, cls_onehot], axis=-1) * obj_mask[..., None]
    target = target.astype(jnp.float32)
    anchors = jnp.array([[0.28, 0.22], [0.38, 0.48], [0.90, 0.78]],
                        dtype=jnp.float32)

    loss = yolo_loss_pallas(preds, target, anchors)
    loss = jax.block_until_ready(loss)

    ref = _numpy_reference(np.asarray(preds), np.asarray(target),
                           np.asarray(anchors))
    assert np.isfinite(float(loss))
    assert abs(float(loss) - float(ref)) <= 5e-3 * (1.0 + abs(float(ref))), (
        float(loss), float(ref))
    print("KERNEL_OK")
</pallas_src>

<mosaic_0001>
module attributes {stable_mosaic.version = 11 : i64} {
  func.func @_loss_kernel(%arg0: i32, %arg1: i32, %arg2: memref<12xf32, #tpu.memory_space<smem>>, %arg3: memref<16x1x8x128xf32, #tpu.memory_space<vmem>>, %arg4: memref<16x1x8x128xf32, #tpu.memory_space<vmem>>, %arg5: memref<6xf32, #tpu.memory_space<smem>>, %arg6: memref<6x8x128xf32, #tpu.memory_space<vmem>>) attributes {dimension_semantics = [#tpu.dimension_semantics<arbitrary>, #tpu.dimension_semantics<arbitrary>], iteration_bounds = array<i64: 3, 1>, scalar_prefetch = 0 : i64, scratch_operands = 1 : i64, tpu.core_type = #tpu.core_type<tc>, window_params = [{transform_indices = @transform_0, window_bounds = array<i64: 12>}, {transform_indices = @transform_1, window_bounds = array<i64: 16, 1, 8, 128>}, {transform_indices = @transform_2, window_bounds = array<i64: 16, 1, 8, 128>}, {transform_indices = @transform_3, window_bounds = array<i64: 6>}]} {
    %c0_i32 = arith.constant 0 : i32
    %0 = arith.cmpi eq, %arg0, %c0_i32 : i32
    %c0_i32_0 = arith.constant 0 : i32
    %1 = arith.cmpi eq, %arg1, %c0_i32_0 : i32
    %2 = arith.andi %0, %1 : i1
    %3 = arith.extui %2 : i1 to i32
    %c0_i32_1 = arith.constant 0 : i32
    %4 = arith.cmpi ne, %3, %c0_i32_1 : i32
    scf.if %4 {
      %cst_270 = arith.constant 0.000000e+00 : f32
      %376 = vector.broadcast %cst_270 : f32 to vector<6x8x128xf32>
      %c0_271 = arith.constant 0 : index
      %c0_272 = arith.constant 0 : index
      %c0_273 = arith.constant 0 : index
      %377 = vector.load %arg6[%c0_271, %c0_272, %c0_273] : memref<6x8x128xf32, #tpu.memory_space<vmem>>, vector<6x8x128xf32>
      tpu.vector_store %arg6[%c0_271, %c0_272, %c0_273], %376 {strides = array<i32>} : memref<6x8x128xf32, #tpu.memory_space<vmem>>, vector<6x8x128xf32>,
    } else {
    }
    %5 = tpu.iota {dimensions = array<i32: 0>} : vector<8x128xi32>
    %6 = tpu.iota {dimensions = array<i32: 1>} : vector<8x128xi32>
    %c8_i32 = arith.constant 8 : i32
    %7 = arith.muli %arg1, %c8_i32 : i32
    %8 = vector.broadcast %7 : i32 to vector<8x128xi32>
    %9 = arith.addi %8, %5 : vector<8x128xi32>
    %c128_i32 = arith.constant 128 : i32
    %10 = vector.broadcast %c128_i32 : i32 to vector<8x128xi32>
    %11 = arith.muli %9, %10 : vector<8x128xi32>
    %12 = arith.addi %11, %6 : vector<8x128xi32>
    %c128_i32_2 = arith.constant 128 : i32
    %13 = vector.broadcast %c128_i32_2 : i32 to vector<8x128xi32>
    %14 = arith.cmpi slt, %12, %13 : vector<8x128xi32>
    %15 = arith.extui %14 : vector<8x128xi1> to vector<8x128xi32>
    %16 = arith.sitofp %15 : vector<8x128xi32> to vector<8x128xf32>
    %c2_i32 = arith.constant 2 : i32
    %17 = arith.muli %c2_i32, %arg0 : i32
    %18 = arith.index_cast %17 : i32 to index
    %19 = memref.load %arg2[%18] : memref<12xf32, #tpu.memory_space<smem>>
    %c2_i32_3 = arith.constant 2 : i32
    %20 = arith.muli %c2_i32_3, %arg0 : i32
    %c1_i32 = arith.constant 1 : i32
    %21 = arith.addi %20, %c1_i32 : i32
    %22 = arith.index_cast %21 : i32 to index
    %23 = memref.load %arg2[%22] : memref<12xf32, #tpu.memory_space<smem>>
    %c2_i32_4 = arith.constant 2 : i32
    %24 = arith.muli %c2_i32_4, %arg0 : i32
    %c6_i32 = arith.constant 6 : i32
    %25 = arith.addi %c6_i32, %24 : i32
    %26 = arith.index_cast %25 : i32 to index
    %27 = memref.load %arg2[%26] : memref<12xf32, #tpu.memory_space<smem>>
    %c2_i32_5 = arith.constant 2 : i32
    %28 = arith.muli %c2_i32_5, %arg0 : i32
    %c6_i32_6 = arith.constant 6 : i32
    %29 = arith.addi %c6_i32_6, %28 : i32
    %c1_i32_7 = arith.constant 1 : i32
    %30 = arith.addi %29, %c1_i32_7 : i32
    %31 = arith.index_cast %30 : i32 to index
    %32 = memref.load %arg2[%31] : memref<12xf32, #tpu.memory_space<smem>>
    %c0 = arith.constant 0 : index
    %c0_8 = arith.constant 0 : index
    %c0_9 = arith.constant 0 : index
    %c0_10 = arith.constant 0 : index
    %33 = vector.load %arg3[%c0, %c0_8, %c0_9, %c0_10] : memref<16x1x8x128xf32, #tpu.memory_space<vmem>>, vector<1x1x8x128xf32>
    %34 = vector.shape_cast %33 : vector<1x1x8x128xf32> to vector<8x128xf32>
    %c0_11 = arith.constant 0 : index
    %c0_12 = arith.constant 0 : index
    %c0_13 = arith.constant 0 : index
    %c0_14 = arith.constant 0 : index
    %35 = vector.load %arg4[%c0_11, %c0_12, %c0_13, %c0_14] : memref<16x1x8x128xf32, #tpu.memory_space<vmem>>, vector<1x1x8x128xf32>
    %36 = vector.shape_cast %35 : vector<1x1x8x128xf32> to vector<8x128xf32>
    %c1 = arith.constant 1 : index
    %c0_15 = arith.constant 0 : index
    %c0_16 = arith.constant 0 : index
    %c0_17 = arith.constant 0 : index
    %37 = vector.load %arg4[%c1, %c0_15, %c0_16, %c0_17] : memref<16x1x8x128xf32, #tpu.memory_space<vmem>>, vector<1x1x8x128xf32>
    %38 = vector.shape_cast %37 : vector<1x1x8x128xf32> to vector<8x128xf32>
    %cst = arith.constant 1.000000e+00 : f32
    %39 = vector.broadcast %cst : f32 to vector<8x128xf32>
    %40 = arith.cmpf oeq, %36, %39 : vector<8x128xf32>
    %41 = arith.extui %40 : vector<8x128xi1> to vector<8x128xi32>
    %42 = arith.sitofp %41 : vector<8x128xi32> to vector<8x128xf32>
    %43 = arith.mulf %42, %16 : vector<8x128xf32>
    %cst_18 = arith.constant 0.000000e+00 : f32
    %44 = vector.broadcast %cst_18 : f32 to vector<8x128xf32>
    %45 = arith.cmpf oeq, %38, %44 : vector<8x128xf32>
    %46 = arith.extui %45 : vector<8x128xi1> to vector<8x128xi32>
    %47 = arith.sitofp %46 : vector<8x128xi32> to vector<8x128xf32>
    %48 = arith.mulf %47, %16 : vector<8x128xf32>
    %49 = math.absf %34 : vector<8x128xf32>
    %cst_19 = arith.constant 0.000000e+00 : f32
    %50 = vector.broadcast %cst_19 : f32 to vector<8x128xf32>
    %51 = arith.subf %50, %49 : vector<8x128xf32>
    %52 = math.exp %51 : vector<8x128xf32>
    %cst_20 = arith.constant 0.000000e+00 : f32
    %53 = vector.broadcast %cst_20 : f32 to vector<8x128xf32>
    %54 = arith.maximumf %34, %53 : vector<8x128xf32>
    %55 = arith.mulf %34, %36 : vector<8x128xf32>
    %56 = arith.subf %54, %55 : vector<8x128xf32>
    %cst_21 = arith.constant 1.000000e+00 : f32
    %57 = vector.broadcast %cst_21 : f32 to vector<8x128xf32>
    %58 = arith.addf %57, %52 : vector<8x128xf32>
    %59 = math.log %58 : vector<8x128xf32>
    %60 = arith.addf %56, %59 : vector<8x128xf32>
    %cst_22 = arith.constant 1.000000e+00 : f32
    %61 = vector.broadcast %cst_22 : f32 to vector<8x128xf32>
    %62 = arith.addf %61, %52 : vector<8x128xf32>
    %63 = tpu.reciprocal %62 {approx = true} : vector<8x128xf32> -> vector<8x128xf32>
    %cst_23 = arith.constant 0.000000e+00 : f32
    %64 = vector.broadcast %cst_23 : f32 to vector<8x128xf32>
    %65 = arith.cmpf oge, %34, %64 : vector<8x128xf32>
    %66 = arith.mulf %52, %63 : vector<8x128xf32>
    %67 = arith.select %65, %63, %66 : vector<8x128xi1>, vector<8x128xf32>
    %c1_24 = arith.constant 1 : index
    %c0_25 = arith.constant 0 : index
    %c0_26 = arith.constant 0 : index
    %c0_27 = arith.constant 0 : index
    %68 = vector.load %arg3[%c1_24, %c0_25, %c0_26, %c0_27] : memref<16x1x8x128xf32, #tpu.memory_space<vmem>>, vector<1x1x8x128xf32>
    %69 = vector.shape_cast %68 : vector<1x1x8x128xf32> to vector<8x128xf32>
    %c2 = arith.constant 2 : index
    %c0_28 = arith.constant 0 : index
    %c0_29 = arith.constant 0 : index
    %c0_30 = arith.constant 0 : index
    %70 = vector.load %arg3[%c2, %c0_28, %c0_29, %c0_30] : memref<16x1x8x128xf32, #tpu.memory_space<vmem>>, vector<1x1x8x128xf32>
    %71 = vector.shape_cast %70 : vector<1x1x8x128xf32> to vector<8x128xf32>
    %c3 = arith.constant 3 : index
    %c0_31 = arith.constant 0 : index
    %c0_32 = arith.constant 0 : index
    %c0_33 = arith.constant 0 : index
    %72 = vector.load %arg3[%c3, %c0_31, %c0_32, %c0_33] : memref<16x1x8x128xf32, #tpu.memory_space<vmem>>, vector<1x1x8x128xf32>
    %73 = vector.shape_cast %72 : vector<1x1x8x128xf32> to vector<8x128xf32>
    %c4 = arith.constant 4 : index
    %c0_34 = arith.constant 0 : index
    %c0_35 = arith.constant 0 : index
    %c0_36 = arith.constant 0 : index
    %74 = vector.load %arg3[%c4, %c0_34, %c0_35, %c0_36] : memref<16x1x8x128xf32, #tpu.memory_space<vmem>>, vector<1x1x8x128xf32>
    %75 = vector.shape_cast %74 : vector<1x1x8x128xf32> to vector<8x128xf32>
    %c1_37 = arith.constant 1 : index
    %c0_38 = arith.constant 0 : index
    %c0_39 = arith.constant 0 : index
    %c0_40 = arith.constant 0 : index
    %76 = vector.load %arg4[%c1_37, %c0_38, %c0_39, %c0_40] : memref<16x1x8x128xf32, #tpu.memory_space<vmem>>, vector<1x1x8x128xf32>
    %77 = vector.shape_cast %76 : vector<1x1x8x128xf32> to vector<8x128xf32>
    %c2_41 = arith.constant 2 : index
    %c0_42 = arith.constant 0 : index
    %c0_43 = arith.constant 0 : index
    %c0_44 = arith.constant 0 : index
    %78 = vector.load %arg4[%c2_41, %c0_42, %c0_43, %c0_44] : memref<16x1x8x128xf32, #tpu.memory_space<vmem>>, vector<1x1x8x128xf32>
    %79 = vector.shape_cast %78 : vector<1x1x8x128xf32> to vector<8x128xf32>
    %c3_45 = arith.constant 3 : index
    %c0_46 = arith.constant 0 : index
    %c0_47 = arith.constant 0 : index
    %c0_48 = arith.constant 0 : index
    %80 = vector.load %arg4[%c3_45, %c0_46, %c0_47, %c0_48] : memref<16x1x8x128xf32, #tpu.memory_space<vmem>>, vector<1x1x8x128xf32>
    %81 = vector.shape_cast %80 : vector<1x1x8x128xf32> to vector<8x128xf32>
    %c4_49 = arith.constant 4 : index
    %c0_50 = arith.constant 0 : index
    %c0_51 = arith.constant 0 : index
    %c0_52 = arith.constant 0 : index
    %82 = vector.load %arg4[%c4_49, %c0_50, %c0_51, %c0_52] : memref<16x1x8x128xf32, #tpu.memory_space<vmem>>, vector<1x1x8x128xf32>
    %83 = vector.shape_cast %82 : vector<1x1x8x128xf32> to vector<8x128xf32>
    %cst_53 = arith.constant 0.000000e+00 : f32
    %84 = vector.broadcast %cst_53 : f32 to vector<8x128xf32>
    %85 = arith.subf %84, %69 : vector<8x128xf32>
    %86 = math.exp %85 : vector<8x128xf32>
    %cst_54 = arith.constant 1.000000e+00 : f32
    %87 = vector.broadcast %cst_54 : f32 to vector<8x128xf32>
    %88 = arith.addf %87, %86 : vector<8x128xf32>
    %89 = tpu.reciprocal %88 {approx = true} : vector<8x128xf32> -> vector<8x128xf32>
    %cst_55 = arith.constant 0.000000e+00 : f32
    %90 = vector.broadcast %cst_55 : f32 to vector<8x128xf32>
    %91 = arith.subf %90, %71 : vector<8x128xf32>
    %92 = math.exp %91 : vector<8x128xf32>
    %cst_56 = arith.constant 1.000000e+00 : f32
    %93 = vector.broadcast %cst_56 : f32 to vector<8x128xf32>
    %94 = arith.addf %93, %92 : vector<8x128xf32>
    %95 = tpu.reciprocal %94 {approx = true} : vector<8x128xf32> -> vector<8x128xf32>
    %96 = math.exp %73 : vector<8x128xf32>
    %97 = vector.broadcast %19 : f32 to vector<8x128xf32>
    %98 = arith.mulf %96, %97 : vector<8x128xf32>
    %99 = math.exp %75 : vector<8x128xf32>
    %100 = vector.broadcast %23 : f32 to vector<8x128xf32>
    %101 = arith.mulf %99, %100 : vector<8x128xf32>
    %cst_57 = arith.constant 5.000000e-01 : f32
    %102 = vector.broadcast %cst_57 : f32 to vector<8x128xf32>
    %103 = arith.mulf %102, %98 : vector<8x128xf32>
    %cst_58 = arith.constant 5.000000e-01 : f32
    %104 = vector.broadcast %cst_58 : f32 to vector<8x128xf32>
    %105 = arith.mulf %104, %101 : vector<8x128xf32>
    %cst_59 = arith.constant 5.000000e-01 : f32
    %106 = vector.broadcast %cst_59 : f32 to vector<8x128xf32>
    %107 = arith.mulf %106, %81 : vector<8x128xf32>
    %cst_60 = arith.constant 5.000000e-01 : f32
    %108 = vector.broadcast %cst_60 : f32 to vector<8x128xf32>
    %109 = arith.mulf %108, %83 : vector<8x128xf32>
    %110 = arith.subf %89, %103 : vector<8x128xf32>
    %111 = arith.addf %89, %103 : vector<8x128xf32>
    %112 = arith.subf %95, %105 : vector<8x128xf32>
    %113 = arith.addf %95, %105 : vector<8x128xf32>
    %114 = arith.subf %77, %107 : vector<8x128xf32>
    %115 = arith.addf %77, %107 : vector<8x128xf32>
    %116 = arith.subf %79, %109 : vector<8x128xf32>
    %117 = arith.addf %79, %109 : vector<8x128xf32>
    %118 = arith.minimumf %111, %115 : vector<8x128xf32>
    %119 = arith.maximumf %110, %114 : vector<8x128xf32>
    %120 = arith.subf %118, %119 : vector<8x128xf32>
    %cst_61 = arith.constant 0.000000e+00 : f32
    %121 = vector.broadcast %cst_61 : f32 to vector<8x128xf32>
    %122 = arith.maximumf %120, %121 : vector<8x128xf32>
    %123 = arith.minimumf %113, %117 : vector<8x128xf32>
    %124 = arith.maximumf %112, %116 : vector<8x128xf32>
    %125 = arith.subf %123, %124 : vector<8x128xf32>
    %cst_62 = arith.constant 0.000000e+00 : f32
    %126 = vector.broadcast %cst_62 : f32 to vector<8x128xf32>
    %127 = arith.maximumf %125, %126 : vector<8x128xf32>
    %128 = arith.mulf %122, %127 : vector<8x128xf32>
    %129 = arith.subf %111, %110 : vector<8x128xf32>
    %130 = arith.subf %113, %112 : vector<8x128xf32>
    %131 = arith.mulf %129, %130 : vector<8x128xf32>
    %132 = math.absf %131 : vector<8x128xf32>
    %133 = arith.subf %115, %114 : vector<8x128xf32>
    %134 = arith.subf %117, %116 : vector<8x128xf32>
    %135 = arith.mulf %133, %134 : vector<8x128xf32>
    %136 = math.absf %135 : vector<8x128xf32>
    %137 = arith.addf %132, %136 : vector<8x128xf32>
    %138 = arith.subf %137, %128 : vector<8x128xf32>
    %cst_63 = arith.constant 9.99999997E-7 : f32
    %139 = vector.broadcast %cst_63 : f32 to vector<8x128xf32>
    %140 = arith.addf %138, %139 : vector<8x128xf32>
    %141 = tpu.reciprocal %140 {approx = true} : vector<8x128xf32> -> vector<8x128xf32>
    %142 = arith.mulf %128, %141 : vector<8x128xf32>
    %143 = arith.mulf %142, %36 : vector<8x128xf32>
    %144 = arith.subf %67, %143 : vector<8x128xf32>
    %145 = arith.mulf %144, %144 : vector<8x128xf32>
    %146 = vector.broadcast %27 : f32 to vector<8x128xf32>
    %147 = arith.mulf %81, %146 : vector<8x128xf32>
    %cst_64 = arith.constant 1.000000e-16 : f32
    %148 = vector.broadcast %cst_64 : f32 to vector<8x128xf32>
    %149 = arith.addf %148, %147 : vector<8x128xf32>
    %150 = math.log %149 : vector<8x128xf32>
    %151 = vector.broadcast %32 : f32 to vector<8x128xf32>
    %152 = arith.mulf %83, %151 : vector<8x128xf32>
    %cst_65 = arith.constant 1.000000e-16 : f32
    %153 = vector.broadcast %cst_65 : f32 to vector<8x128xf32>
    %154 = arith.addf %153, %152 : vector<8x128xf32>
    %155 = math.log %154 : vector<8x128xf32>
    %156 = arith.subf %89, %77 : vector<8x128xf32>
    %157 = arith.subf %95, %79 : vector<8x128xf32>
    %158 = arith.subf %73, %150 : vector<8x128xf32>
    %159 = arith.subf %75, %155 : vector<8x128xf32>
    %160 = arith.mulf %156, %156 : vector<8x128xf32>
    %161 = arith.mulf %157, %157 : vector<8x128xf32>
    %162 = arith.addf %160, %161 : vector<8x128xf32>
    %163 = arith.mulf %158, %158 : vector<8x128xf32>
    %164 = arith.addf %162, %163 : vector<8x128xf32>
    %165 = arith.mulf %159, %159 : vector<8x128xf32>
    %166 = arith.addf %164, %165 : vector<8x128xf32>
    %c5 = arith.constant 5 : index
    %c0_66 = arith.constant 0 : index
    %c0_67 = arith.constant 0 : index
    %c0_68 = arith.constant 0 : index
    %167 = vector.load %arg3[%c5, %c0_66, %c0_67, %c0_68] : memref<16x1x8x128xf32, #tpu.memory_space<vmem>>, vector<1x1x8x128xf32>
    %168 = vector.shape_cast %167 : vector<1x1x8x128xf32> to vector<8x128xf32>
    %c6 = arith.constant 6 : index
    %c0_69 = arith.constant 0 : index
    %c0_70 = arith.constant 0 : index
    %c0_71 = arith.constant 0 : index
    %169 = vector.load %arg3[%c6, %c0_69, %c0_70, %c0_71] : memref<16x1x8x128xf32, #tpu.memory_space<vmem>>, vector<1x1x8x128xf32>
    %170 = vector.shape_cast %169 : vector<1x1x8x128xf32> to vector<8x128xf32>
    %171 = arith.maximumf %168, %170 : vector<8x128xf32>
    %c7 = arith.constant 7 : index
    %c0_72 = arith.constant 0 : index
    %c0_73 = arith.constant 0 : index
    %c0_74 = arith.constant 0 : index
    %172 = vector.load %arg3[%c7, %c0_72, %c0_73, %c0_74] : memref<16x1x8x128xf32, #tpu.memory_space<vmem>>, vector<1x1x8x128xf32>
    %173 = vector.shape_cast %172 : vector<1x1x8x128xf32> to vector<8x128xf32>
    %174 = arith.maximumf %171, %173 : vector<8x128xf32>
    %c8 = arith.constant 8 : index
    %c0_75 = arith.constant 0 : index
    %c0_76 = arith.constant 0 : index
    %c0_77 = arith.constant 0 : index
    %175 = vector.load %arg3[%c8, %c0_75, %c0_76, %c0_77] : memref<16x1x8x128xf32, #tpu.memory_space<vmem>>, vector<1x1x8x128xf32>
    %176 = vector.shape_cast %175 : vector<1x1x8x128xf32> to vector<8x128xf32>
    %177 = arith.maximumf %174, %176 : vector<8x128xf32>
    %c9 = arith.constant 9 : index
    %c0_78 = arith.constant 0 : index
    %c0_79 = arith.constant 0 : index
    %c0_80 = arith.constant 0 : index
    %178 = vector.load %arg3[%c9, %c0_78, %c0_79, %c0_80] : memref<16x1x8x128xf32, #tpu.memory_space<vmem>>, vector<1x1x8x128xf32>
    %179 = vector.shape_cast %178 : vector<1x1x8x128xf32> to vector<8x128xf32>
    %180 = arith.maximumf %177, %179 : vector<8x128xf32>
    %c10 = arith.constant 10 : index
    %c0_81 = arith.constant 0 : index
    %c0_82 = arith.constant 0 : index
    %c0_83 = arith.constant 0 : index
    %181 = vector.load %arg3[%c10, %c0_81, %c0_82, %c0_83] : memref<16x1x8x128xf32, #tpu.memory_space<vmem>>, vector<1x1x8x128xf32>
    %182 = vector.shape_cast %181 : vector<1x1x8x128xf32> to vector<8x128xf32>
    %183 = arith.maximumf %180, %182 : vector<8x128xf32>
    %c11 = arith.constant 11 : index
    %c0_84 = arith.constant 0 : index
    %c0_85 = arith.constant 0 : index
    %c0_86 = arith.constant 0 : index
    %184 = vector.load %arg3[%c11, %c0_84, %c0_85, %c0_86] : memref<16x1x8x128xf32, #tpu.memory_space<vmem>>, vector<1x1x8x128xf32>
    %185 = vector.shape_cast %184 : vector<1x1x8x128xf32> to vector<8x128xf32>
    %186 = arith.maximumf %183, %185 : vector<8x128xf32>
    %c12 = arith.constant 12 : index
    %c0_87 = arith.constant 0 : index
    %c0_88 = arith.constant 0 : index
    %c0_89 = arith.constant 0 : index
    %187 = vector.load %arg3[%c12, %c0_87, %c0_88, %c0_89] : memref<16x1x8x128xf32, #tpu.memory_space<vmem>>, vector<1x1x8x128xf32>
    %188 = vector.shape_cast %187 : vector<1x1x8x128xf32> to vector<8x128xf32>
    %189 = arith.maximumf %186, %188 : vector<8x128xf32>
    %c13 = arith.constant 13 : index
    %c0_90 = arith.constant 0 : index
    %c0_91 = arith.constant 0 : index
    %c0_92 = arith.constant 0 : index
    %190 = vector.load %arg3[%c13, %c0_90, %c0_91, %c0_92] : memref<16x1x8x128xf32, #tpu.memory_space<vmem>>, vector<1x1x8x128xf32>
    %191 = vector.shape_cast %190 : vector<1x1x8x128xf32> to vector<8x128xf32>
    %192 = arith.maximumf %189, %191 : vector<8x128xf32>
    %c14 = arith.constant 14 : index
    %c0_93 = arith.constant 0 : index
    %c0_94 = arith.constant 0 : index
    %c0_95 = arith.constant 0 : index
    %193 = vector.load %arg3[%c14, %c0_93, %c0_94, %c0_95] : memref<16x1x8x128xf32, #tpu.memory_space<vmem>>, vector<1x1x8x128xf32>
    %194 = vector.shape_cast %193 : vector<1x1x8x128xf32> to vector<8x128xf32>
    %195 = arith.maximumf %192, %194 : vector<8x128xf32>
    %c15 = arith.constant 15 : index
    %c0_96 = arith.constant 0 : index
    %c0_97 = arith.constant 0 : index
    %c0_98 = arith.constant 0 : index
    %196 = vector.load %arg3[%c15, %c0_96, %c0_97, %c0_98] : memref<16x1x8x128xf32, #tpu.memory_space<vmem>>, vector<1x1x8x128xf32>
    %197 = vector.shape_cast %196 : vector<1x1x8x128xf32> to vector<8x128xf32>
    %198 = arith.maximumf %195, %197 : vector<8x128xf32>
    %c5_99 = arith.constant 5 : index
    %c0_100 = arith.constant 0 : index
    %c0_101 = arith.constant 0 : index
    %c0_102 = arith.constant 0 : index
    %199 = vector.load %arg3[%c5_99, %c0_100, %c0_101, %c0_102] : memref<16x1x8x128xf32, #tpu.memory_space<vmem>>, vector<1x1x8x128xf32>
    %200 = vector.shape_cast %199 : vector<1x1x8x128xf32> to vector<8x128xf32>
    %201 = arith.subf %200, %198 : vector<8x128xf32>
    %202 = math.exp %201 : vector<8x128xf32>
    %c6_103 = arith.constant 6 : index
    %c0_104 = arith.constant 0 : index
    %c0_105 = arith.constant 0 : index
    %c0_106 = arith.constant 0 : index
    %203 = vector.load %arg3[%c6_103, %c0_104, %c0_105, %c0_106] : memref<16x1x8x128xf32, #tpu.memory_space<vmem>>, vector<1x1x8x128xf32>
    %204 = vector.shape_cast %203 : vector<1x1x8x128xf32> to vector<8x128xf32>
    %205 = arith.subf %204, %198 : vector<8x128xf32>
    %206 = math.exp %205 : vector<8x128xf32>
    %207 = arith.addf %202, %206 : vector<8x128xf32>
    %c7_107 = arith.constant 7 : index
    %c0_108 = arith.constant 0 : index
    %c0_109 = arith.constant 0 : index
    %c0_110 = arith.constant 0 : index
    %208 = vector.load %arg3[%c7_107, %c0_108, %c0_109, %c0_110] : memref<16x1x8x128xf32, #tpu.memory_space<vmem>>, vector<1x1x8x128xf32>
    %209 = vector.shape_cast %208 : vector<1x1x8x128xf32> to vector<8x128xf32>
    %210 = arith.subf %209, %198 : vector<8x128xf32>
    %211 = math.exp %210 : vector<8x128xf32>
    %212 = arith.addf %207, %211 : vector<8x128xf32>
    %c8_111 = arith.constant 8 : index
    %c0_112 = arith.constant 0 : index
    %c0_113 = arith.constant 0 : index
    %c0_114 = arith.constant 0 : index
    %213 = vector.load %arg3[%c8_111, %c0_112, %c0_113, %c0_114] : memref<16x1x8x128xf32, #tpu.memory_space<vmem>>, vector<1x1x8x128xf32>
    %214 = vector.shape_cast %213 : vector<1x1x8x128xf32> to vector<8x128xf32>
    %215 = arith.subf %214, %198 : vector<8x128xf32>
    %216 = math.exp %215 : vector<8x128xf32>
    %217 = arith.addf %212, %216 : vector<8x128xf32>
    %c9_115 = arith.constant 9 : index
    %c0_116 = arith.constant 0 : index
    %c0_117 = arith.constant 0 : index
    %c0_118 = arith.constant 0 : index
    %218 = vector.load %arg3[%c9_115, %c0_116, %c0_117, %c0_118] : memref<16x1x8x128xf32, #tpu.memory_space<vmem>>, vector<1x1x8x128xf32>
    %219 = vector.shape_cast %218 : vector<1x1x8x128xf32> to vector<8x128xf32>
    %220 = arith.subf %219, %198 : vector<8x128xf32>
    %221 = math.exp %220 : vector<8x128xf32>
    %222 = arith.addf %217, %221 : vector<8x128xf32>
    %c10_119 = arith.constant 10 : index
    %c0_120 = arith.constant 0 : index
    %c0_121 = arith.constant 0 : index
    %c0_122 = arith.constant 0 : index
    %223 = vector.load %arg3[%c10_119, %c0_120, %c0_121, %c0_122] : memref<16x1x8x128xf32, #tpu.memory_space<vmem>>, vector<1x1x8x128xf32>
    %224 = vector.shape_cast %223 : vector<1x1x8x128xf32> to vector<8x128xf32>
    %225 = arith.subf %224, %198 : vector<8x128xf32>
    %226 = math.exp %225 : vector<8x128xf32>
    %227 = arith.addf %222, %226 : vector<8x128xf32>
    %c11_123 = arith.constant 11 : index
    %c0_124 = arith.constant 0 : index
    %c0_125 = arith.constant 0 : index
    %c0_126 = arith.constant 0 : index
    %228 = vector.load %arg3[%c11_123, %c0_124, %c0_125, %c0_126] : memref<16x1x8x128xf32, #tpu.memory_space<vmem>>, vector<1x1x8x128xf32>
    %229 = vector.shape_cast %228 : vector<1x1x8x128xf32> to vector<8x128xf32>
    %230 = arith.subf %229, %198 : vector<8x128xf32>
    %231 = math.exp %230 : vector<8x128xf32>
    %232 = arith.addf %227, %231 : vector<8x128xf32>
    %c12_127 = arith.constant 12 : index
    %c0_128 = arith.constant 0 : index
    %c0_129 = arith.constant 0 : index
    %c0_130 = arith.constant 0 : index
    %233 = vector.load %arg3[%c12_127, %c0_128, %c0_129, %c0_130] : memref<16x1x8x128xf32, #tpu.memory_space<vmem>>, vector<1x1x8x128xf32>
    %234 = vector.shape_cast %233 : vector<1x1x8x128xf32> to vector<8x128xf32>
    %235 = arith.subf %234, %198 : vector<8x128xf32>
    %236 = math.exp %235 : vector<8x128xf32>
    %237 = arith.addf %232, %236 : vector<8x128xf32>
    %c13_131 = arith.constant 13 : index
    %c0_132 = arith.constant 0 : index
    %c0_133 = arith.constant 0 : index
    %c0_134 = arith.constant 0 : index
    %238 = vector.load %arg3[%c13_131, %c0_132, %c0_133, %c0_134] : memref<16x1x8x128xf32, #tpu.memory_space<vmem>>, vector<1x1x8x128xf32>
    %239 = vector.shape_cast %238 : vector<1x1x8x128xf32> to vector<8x128xf32>
    %240 = arith.subf %239, %198 : vector<8x128xf32>
    %241 = math.exp %240 : vector<8x128xf32>
    %242 = arith.addf %237, %241 : vector<8x128xf32>
    %c14_135 = arith.constant 14 : index
    %c0_136 = arith.constant 0 : index
    %c0_137 = arith.constant 0 : index
    %c0_138 = arith.constant 0 : index
    %243 = vector.load %arg3[%c14_135, %c0_136, %c0_137, %c0_138] : memref<16x1x8x128xf32, #tpu.memory_space<vmem>>, vector<1x1x8x128xf32>
    %244 = vector.shape_cast %243 : vector<1x1x8x128xf32> to vector<8x128xf32>
    %245 = arith.subf %244, %198 : vector<8x128xf32>
    %246 = math.exp %245 : vector<8x128xf32>
    %247 = arith.addf %242, %246 : vector<8x128xf32>
    %c15_139 = arith.constant 15 : index
    %c0_140 = arith.constant 0 : index
    %c0_141 = arith.constant 0 : index
    %c0_142 = arith.constant 0 : index
    %248 = vector.load %arg3[%c15_139, %c0_140, %c0_141, %c0_142] : memref<16x1x8x128xf32, #tpu.memory_space<vmem>>, vector<1x1x8x128xf32>
    %249 = vector.shape_cast %248 : vector<1x1x8x128xf32> to vector<8x128xf32>
    %250 = arith.subf %249, %198 : vector<8x128xf32>
    %251 = math.exp %250 : vector<8x128xf32>
    %252 = arith.addf %247, %251 : vector<8x128xf32>
    %253 = math.log %252 : vector<8x128xf32>
    %254 = arith.addf %198, %253 : vector<8x128xf32>
    %c5_143 = arith.constant 5 : index
    %c0_144 = arith.constant 0 : index
    %c0_145 = arith.constant 0 : index
    %c0_146 = arith.constant 0 : index
    %255 = vector.load %arg4[%c5_143, %c0_144, %c0_145, %c0_146] : memref<16x1x8x128xf32, #tpu.memory_space<vmem>>, vector<1x1x8x128xf32>
    %256 = vector.shape_cast %255 : vector<1x1x8x128xf32> to vector<8x128xf32>
    %c5_147 = arith.constant 5 : index
    %c0_148 = arith.constant 0 : index
    %c0_149 = arith.constant 0 : index
    %c0_150 = arith.constant 0 : index
    %257 = vector.load %arg3[%c5_147, %c0_148, %c0_149, %c0_150] : memref<16x1x8x128xf32, #tpu.memory_space<vmem>>, vector<1x1x8x128xf32>
    %258 = vector.shape_cast %257 : vector<1x1x8x128xf32> to vector<8x128xf32>
    %259 = arith.subf %254, %258 : vector<8x128xf32>
    %260 = arith.mulf %256, %259 : vector<8x128xf32>
    %c6_151 = arith.constant 6 : index
    %c0_152 = arith.constant 0 : index
    %c0_153 = arith.constant 0 : index
    %c0_154 = arith.constant 0 : index
    %261 = vector.load %arg4[%c6_151, %c0_152, %c0_153, %c0_154] : memref<16x1x8x128xf32, #tpu.memory_space<vmem>>, vector<1x1x8x128xf32>
    %262 = vector.shape_cast %261 : vector<1x1x8x128xf32> to vector<8x128xf32>
    %c6_155 = arith.constant 6 : index
    %c0_156 = arith.constant 0 : index
    %c0_157 = arith.constant 0 : index
    %c0_158 = arith.constant 0 : index
    %263 = vector.load %arg3[%c6_155, %c0_156, %c0_157, %c0_158] : memref<16x1x8x128xf32, #tpu.memory_space<vmem>>, vector<1x1x8x128xf32>
    %264 = vector.shape_cast %263 : vector<1x1x8x128xf32> to vector<8x128xf32>
    %265 = arith.subf %254, %264 : vector<8x128xf32>
    %266 = arith.mulf %262, %265 : vector<8x128xf32>
    %267 = arith.addf %260, %266 : vector<8x128xf32>
    %c7_159 = arith.constant 7 : index
    %c0_160 = arith.constant 0 : index
    %c0_161 = arith.constant 0 : index
    %c0_162 = arith.constant 0 : index
    %268 = vector.load %arg4[%c7_159, %c0_160, %c0_161, %c0_162] : memref<16x1x8x128xf32, #tpu.memory_space<vmem>>, vector<1x1x8x128xf32>
    %269 = vector.shape_cast %268 : vector<1x1x8x128xf32> to vector<8x128xf32>
    %c7_163 = arith.constant 7 : index
    %c0_164 = arith.constant 0 : index
    %c0_165 = arith.constant 0 : index
    %c0_166 = arith.constant 0 : index
    %270 = vector.load %arg3[%c7_163, %c0_164, %c0_165, %c0_166] : memref<16x1x8x128xf32, #tpu.memory_space<vmem>>, vector<1x1x8x128xf32>
    %271 = vector.shape_cast %270 : vector<1x1x8x128xf32> to vector<8x128xf32>
    %272 = arith.subf %254, %271 : vector<8x128xf32>
    %273 = arith.mulf %269, %272 : vector<8x128xf32>
    %274 = arith.addf %267, %273 : vector<8x128xf32>
    %c8_167 = arith.constant 8 : index
    %c0_168 = arith.constant 0 : index
    %c0_169 = arith.constant 0 : index
    %c0_170 = arith.constant 0 : index
    %275 = vector.load %arg4[%c8_167, %c0_168, %c0_169, %c0_170] : memref<16x1x8x128xf32, #tpu.memory_space<vmem>>, vector<1x1x8x128xf32>
    %276 = vector.shape_cast %275 : vector<1x1x8x128xf32> to vector<8x128xf32>
    %c8_171 = arith.constant 8 : index
    %c0_172 = arith.constant 0 : index
    %c0_173 = arith.constant 0 : index
    %c0_174 = arith.constant 0 : index
    %277 = vector.load %arg3[%c8_171, %c0_172, %c0_173, %c0_174] : memref<16x1x8x128xf32, #tpu.memory_space<vmem>>, vector<1x1x8x128xf32>
    %278 = vector.shape_cast %277 : vector<1x1x8x128xf32> to vector<8x128xf32>
    %279 = arith.subf %254, %278 : vector<8x128xf32>
    %280 = arith.mulf %276, %279 : vector<8x128xf32>
    %281 = arith.addf %274, %280 : vector<8x128xf32>
    %c9_175 = arith.constant 9 : index
    %c0_176 = arith.constant 0 : index
    %c0_177 = arith.constant 0 : index
    %c0_178 = arith.constant 0 : index
    %282 = vector.load %arg4[%c9_175, %c0_176, %c0_177, %c0_178] : memref<16x1x8x128xf32, #tpu.memory_space<vmem>>, vector<1x1x8x128xf32>
    %283 = vector.shape_cast %282 : vector<1x1x8x128xf32> to vector<8x128xf32>
    %c9_179 = arith.constant 9 : index
    %c0_180 = arith.constant 0 : index
    %c0_181 = arith.constant 0 : index
    %c0_182 = arith.constant 0 : index
    %284 = vector.load %arg3[%c9_179, %c0_180, %c0_181, %c0_182] : memref<16x1x8x128xf32, #tpu.memory_space<vmem>>, vector<1x1x8x128xf32>
    %285 = vector.shape_cast %284 : vector<1x1x8x128xf32> to vector<8x128xf32>
    %286 = arith.subf %254, %285 : vector<8x128xf32>
    %287 = arith.mulf %283, %286 : vector<8x128xf32>
    %288 = arith.addf %281, %287 : vector<8x128xf32>
    %c10_183 = arith.constant 10 : index
    %c0_184 = arith.constant 0 : index
    %c0_185 = arith.constant 0 : index
    %c0_186 = arith.constant 0 : index
    %289 = vector.load %arg4[%c10_183, %c0_184, %c0_185, %c0_186] : memref<16x1x8x128xf32, #tpu.memory_space<vmem>>, vector<1x1x8x128xf32>
    %290 = vector.shape_cast %289 : vector<1x1x8x128xf32> to vector<8x128xf32>
    %c10_187 = arith.constant 10 : index
    %c0_188 = arith.constant 0 : index
    %c0_189 = arith.constant 0 : index
    %c0_190 = arith.constant 0 : index
    %291 = vector.load %arg3[%c10_187, %c0_188, %c0_189, %c0_190] : memref<16x1x8x128xf32, #tpu.memory_space<vmem>>, vector<1x1x8x128xf32>
    %292 = vector.shape_cast %291 : vector<1x1x8x128xf32> to vector<8x128xf32>
    %293 = arith.subf %254, %292 : vector<8x128xf32>
    %294 = arith.mulf %290, %293 : vector<8x128xf32>
    %295 = arith.addf %288, %294 : vector<8x128xf32>
    %c11_191 = arith.constant 11 : index
    %c0_192 = arith.constant 0 : index
    %c0_193 = arith.constant 0 : index
    %c0_194 = arith.constant 0 : index
    %296 = vector.load %arg4[%c11_191, %c0_192, %c0_193, %c0_194] : memref<16x1x8x128xf32, #tpu.memory_space<vmem>>, vector<1x1x8x128xf32>
    %297 = vector.shape_cast %296 : vector<1x1x8x128xf32> to vector<8x128xf32>
    %c11_195 = arith.constant 11 : index
    %c0_196 = arith.constant 0 : index
    %c0_197 = arith.constant 0 : index
    %c0_198 = arith.constant 0 : index
    %298 = vector.load %arg3[%c11_195, %c0_196, %c0_197, %c0_198] : memref<16x1x8x128xf32, #tpu.memory_space<vmem>>, vector<1x1x8x128xf32>
    %299 = vector.shape_cast %298 : vector<1x1x8x128xf32> to vector<8x128xf32>
    %300 = arith.subf %254, %299 : vector<8x128xf32>
    %301 = arith.mulf %297, %300 : vector<8x128xf32>
    %302 = arith.addf %295, %301 : vector<8x128xf32>
    %c12_199 = arith.constant 12 : index
    %c0_200 = arith.constant 0 : index
    %c0_201 = arith.constant 0 : index
    %c0_202 = arith.constant 0 : index
    %303 = vector.load %arg4[%c12_199, %c0_200, %c0_201, %c0_202] : memref<16x1x8x128xf32, #tpu.memory_space<vmem>>, vector<1x1x8x128xf32>
    %304 = vector.shape_cast %303 : vector<1x1x8x128xf32> to vector<8x128xf32>
    %c12_203 = arith.constant 12 : index
    %c0_204 = arith.constant 0 : index
    %c0_205 = arith.constant 0 : index
    %c0_206 = arith.constant 0 : index
    %305 = vector.load %arg3[%c12_203, %c0_204, %c0_205, %c0_206] : memref<16x1x8x128xf32, #tpu.memory_space<vmem>>, vector<1x1x8x128xf32>
    %306 = vector.shape_cast %305 : vector<1x1x8x128xf32> to vector<8x128xf32>
    %307 = arith.subf %254, %306 : vector<8x128xf32>
    %308 = arith.mulf %304, %307 : vector<8x128xf32>
    %309 = arith.addf %302, %308 : vector<8x128xf32>
    %c13_207 = arith.constant 13 : index
    %c0_208 = arith.constant 0 : index
    %c0_209 = arith.constant 0 : index
    %c0_210 = arith.constant 0 : index
    %310 = vector.load %arg4[%c13_207, %c0_208, %c0_209, %c0_210] : memref<16x1x8x128xf32, #tpu.memory_space<vmem>>, vector<1x1x8x128xf32>
    %311 = vector.shape_cast %310 : vector<1x1x8x128xf32> to vector<8x128xf32>
    %c13_211 = arith.constant 13 : index
    %c0_212 = arith.constant 0 : index
    %c0_213 = arith.constant 0 : index
    %c0_214 = arith.constant 0 : index
    %312 = vector.load %arg3[%c13_211, %c0_212, %c0_213, %c0_214] : memref<16x1x8x128xf32, #tpu.memory_space<vmem>>, vector<1x1x8x128xf32>
    %313 = vector.shape_cast %312 : vector<1x1x8x128xf32> to vector<8x128xf32>
    %314 = arith.subf %254, %313 : vector<8x128xf32>
    %315 = arith.mulf %311, %314 : vector<8x128xf32>
    %316 = arith.addf %309, %315 : vector<8x128xf32>
    %c14_215 = arith.constant 14 : index
    %c0_216 = arith.constant 0 : index
    %c0_217 = arith.constant 0 : index
    %c0_218 = arith.constant 0 : index
    %317 = vector.load %arg4[%c14_215, %c0_216, %c0_217, %c0_218] : memref<16x1x8x128xf32, #tpu.memory_space<vmem>>, vector<1x1x8x128xf32>
    %318 = vector.shape_cast %317 : vector<1x1x8x128xf32> to vector<8x128xf32>
    %c14_219 = arith.constant 14 : index
    %c0_220 = arith.constant 0 : index
    %c0_221 = arith.constant 0 : index
    %c0_222 = arith.constant 0 : index
    %319 = vector.load %arg3[%c14_219, %c0_220, %c0_221, %c0_222] : memref<16x1x8x128xf32, #tpu.memory_space<vmem>>, vector<1x1x8x128xf32>
    %320 = vector.shape_cast %319 : vector<1x1x8x128xf32> to vector<8x128xf32>
    %321 = arith.subf %254, %320 : vector<8x128xf32>
    %322 = arith.mulf %318, %321 : vector<8x128xf32>
    %323 = arith.addf %316, %322 : vector<8x128xf32>
    %c15_223 = arith.constant 15 : index
    %c0_224 = arith.constant 0 : index
    %c0_225 = arith.constant 0 : index
    %c0_226 = arith.constant 0 : index
    %324 = vector.load %arg4[%c15_223, %c0_224, %c0_225, %c0_226] : memref<16x1x8x128xf32, #tpu.memory_space<vmem>>, vector<1x1x8x128xf32>
    %325 = vector.shape_cast %324 : vector<1x1x8x128xf32> to vector<8x128xf32>
    %c15_227 = arith.constant 15 : index
    %c0_228 = arith.constant 0 : index
    %c0_229 = arith.constant 0 : index
    %c0_230 = arith.constant 0 : index
    %326 = vector.load %arg3[%c15_227, %c0_228, %c0_229, %c0_230] : memref<16x1x8x128xf32, #tpu.memory_space<vmem>>, vector<1x1x8x128xf32>
    %327 = vector.shape_cast %326 : vector<1x1x8x128xf32> to vector<8x128xf32>
    %328 = arith.subf %254, %327 : vector<8x128xf32>
    %329 = arith.mulf %325, %328 : vector<8x128xf32>
    %330 = arith.addf %323, %329 : vector<8x128xf32>
    %c0_231 = arith.constant 0 : index
    %c0_232 = arith.constant 0 : index
    %c0_233 = arith.constant 0 : index
    %331 = vector.load %arg6[%c0_231, %c0_232, %c0_233] : memref<6x8x128xf32, #tpu.memory_space<vmem>>, vector<1x8x128xf32>
    %332 = vector.shape_cast %331 : vector<1x8x128xf32> to vector<8x128xf32>
    %333 = arith.mulf %60, %48 : vector<8x128xf32>
    %334 = arith.addf %332, %333 : vector<8x128xf32>
    %c0_234 = arith.constant 0 : index
    %c0_235 = arith.constant 0 : index
    %c0_236 = arith.constant 0 : index
    %335 = vector.load %arg6[%c0_234, %c0_235, %c0_236] : memref<6x8x128xf32, #tpu.memory_space<vmem>>, vector<1x8x128xf32>
    %336 = vector.shape_cast %335 : vector<1x8x128xf32> to vector<8x128xf32>
    %337 = vector.shape_cast %334 : vector<8x128xf32> to vector<1x8x128xf32>
    tpu.vector_store %arg6[%c0_234, %c0_235, %c0_236], %337 {strides = array<i32>} : memref<6x8x128xf32, #tpu.memory_space<vmem>>, vector<1x8x128xf32>,
    %c1_237 = arith.constant 1 : index
    %c0_238 = arith.constant 0 : index
    %c0_239 = arith.constant 0 : index
    %338 = vector.load %arg6[%c1_237, %c0_238, %c0_239] : memref<6x8x128xf32, #tpu.memory_space<vmem>>, vector<1x8x128xf32>
    %339 = vector.shape_cast %338 : vector<1x8x128xf32> to vector<8x128xf32>
    %340 = arith.addf %339, %48 : vector<8x128xf32>
    %c1_240 = arith.constant 1 : index
    %c0_241 = arith.constant 0 : index
    %c0_242 = arith.constant 0 : index
    %341 = vector.load %arg6[%c1_240, %c0_241, %c0_242] : memref<6x8x128xf32, #tpu.memory_space<vmem>>, vector<1x8x128xf32>
    %342 = vector.shape_cast %341 : vector<1x8x128xf32> to vector<8x128xf32>
    %343 = vector.shape_cast %340 : vector<8x128xf32> to vector<1x8x128xf32>
    tpu.vector_store %arg6[%c1_240, %c0_241, %c0_242], %343 {strides = array<i32>} : memref<6x8x128xf32, #tpu.memory_space<vmem>>, vector<1x8x128xf32>,
    %c2_243 = arith.constant 2 : index
    %c0_244 = arith.constant 0 : index
    %c0_245 = arith.constant 0 : index
    %344 = vector.load %arg6[%c2_243, %c0_244, %c0_245] : memref<6x8x128xf32, #tpu.memory_space<vmem>>, vector<1x8x128xf32>
    %345 = vector.shape_cast %344 : vector<1x8x128xf32> to vector<8x128xf32>
    %346 = arith.mulf %145, %43 : vector<8x128xf32>
    %347 = arith.addf %345, %346 : vector<8x128xf32>
    %c2_246 = arith.constant 2 : index
    %c0_247 = arith.constant 0 : index
    %c0_248 = arith.constant 0 : index
    %348 = vector.load %arg6[%c2_246, %c0_247, %c0_248] : memref<6x8x128xf32, #tpu.memory_space<vmem>>, vector<1x8x128xf32>
    %349 = vector.shape_cast %348 : vector<1x8x128xf32> to vector<8x128xf32>
    %350 = vector.shape_cast %347 : vector<8x128xf32> to vector<1x8x128xf32>
    tpu.vector_store %arg6[%c2_246, %c0_247, %c0_248], %350 {strides = array<i32>} : memref<6x8x128xf32, #tpu.memory_space<vmem>>, vector<1x8x128xf32>,
    %c3_249 = arith.constant 3 : index
    %c0_250 = arith.constant 0 : index
    %c0_251 = arith.constant 0 : index
    %351 = vector.load %arg6[%c3_249, %c0_250, %c0_251] : memref<6x8x128xf32, #tpu.memory_space<vmem>>, vector<1x8x128xf32>
    %352 = vector.shape_cast %351 : vector<1x8x128xf32> to vector<8x128xf32>
    %353 = arith.addf %352, %43 : vector<8x128xf32>
    %c3_252 = arith.constant 3 : index
    %c0_253 = arith.constant 0 : index
    %c0_254 = arith.constant 0 : index
    %354 = vector.load %arg6[%c3_252, %c0_253, %c0_254] : memref<6x8x128xf32, #tpu.memory_space<vmem>>, vector<1x8x128xf32>
    %355 = vector.shape_cast %354 : vector<1x8x128xf32> to vector<8x128xf32>
    %356 = vector.shape_cast %353 : vector<8x128xf32> to vector<1x8x128xf32>
    tpu.vector_store %arg6[%c3_252, %c0_253, %c0_254], %356 {strides = array<i32>} : memref<6x8x128xf32, #tpu.memory_space<vmem>>, vector<1x8x128xf32>,
    %c4_255 = arith.constant 4 : index
    %c0_256 = arith.constant 0 : index
    %c0_257 = arith.constant 0 : index
    %357 = vector.load %arg6[%c4_255, %c0_256, %c0_257] : memref<6x8x128xf32, #tpu.memory_space<vmem>>, vector<1x8x128xf32>
    %358 = vector.shape_cast %357 : vector<1x8x128xf32> to vector<8x128xf32>
    %359 = arith.mulf %166, %43 : vector<8x128xf32>
    %360 = arith.addf %358, %359 : vector<8x128xf32>
    %c4_258 = arith.constant 4 : index
    %c0_259 = arith.constant 0 : index
    %c0_260 = arith.constant 0 : index
    %361 = vector.load %arg6[%c4_258, %c0_259, %c0_260] : memref<6x8x128xf32, #tpu.memory_space<vmem>>, vector<1x8x128xf32>
    %362 = vector.shape_cast %361 : vector<1x8x128xf32> to vector<8x128xf32>
    %363 = vector.shape_cast %360 : vector<8x128xf32> to vector<1x8x128xf32>
    tpu.vector_store %arg6[%c4_258, %c0_259, %c0_260], %363 {strides = array<i32>} : memref<6x8x128xf32, #tpu.memory_space<vmem>>, vector<1x8x128xf32>,
    %c5_261 = arith.constant 5 : index
    %c0_262 = arith.constant 0 : index
    %c0_263 = arith.constant 0 : index
    %364 = vector.load %arg6[%c5_261, %c0_262, %c0_263] : memref<6x8x128xf32, #tpu.memory_space<vmem>>, vector<1x8x128xf32>
    %365 = vector.shape_cast %364 : vector<1x8x128xf32> to vector<8x128xf32>
    %366 = arith.mulf %330, %43 : vector<8x128xf32>
    %367 = arith.addf %365, %366 : vector<8x128xf32>
    %c5_264 = arith.constant 5 : index
    %c0_265 = arith.constant 0 : index
    %c0_266 = arith.constant 0 : index
    %368 = vector.load %arg6[%c5_264, %c0_265, %c0_266] : memref<6x8x128xf32, #tpu.memory_space<vmem>>, vector<1x8x128xf32>
    %369 = vector.shape_cast %368 : vector<1x8x128xf32> to vector<8x128xf32>
    %370 = vector.shape_cast %367 : vector<8x128xf32> to vector<1x8x128xf32>
    tpu.vector_store %arg6[%c5_264, %c0_265, %c0_266], %370 {strides = array<i32>} : memref<6x8x128xf32, #tpu.memory_space<vmem>>, vector<1x8x128xf32>,
    %c2_i32_267 = arith.constant 2 : i32
    %371 = arith.cmpi eq, %arg0, %c2_i32_267 : i32
    %c0_i32_268 = arith.constant 0 : i32
    %372 = arith.cmpi eq, %arg1, %c0_i32_268 : i32
    %373 = arith.andi %371, %372 : i1
    %374 = arith.extui %373 : i1 to i32
    %c0_i32_269 = arith.constant 0 : i32
    %375 = arith.cmpi ne, %374, %c0_i32_269 : i32
    scf.if %375 {
      %c0_270 = arith.constant 0 : index
      %c0_271 = arith.constant 0 : index
      %c0_272 = arith.constant 0 : index
      %376 = vector.load %arg6[%c0_270, %c0_271, %c0_272] : memref<6x8x128xf32, #tpu.memory_space<vmem>>, vector<1x8x128xf32>
      %377 = vector.shape_cast %376 : vector<1x8x128xf32> to vector<8x128xf32>
      %378 = vector.shape_cast %377 : vector<8x128xf32> to vector<1x8x128xf32>
      %cst_273 = arith.constant dense<0.000000e+00> : vector<1xf32>
      %379 = vector.multi_reduction <add>, %378, %cst_273 [1, 2] : vector<1x8x128xf32> to vector<1xf32>
      %380 = vector.shape_cast %379 : vector<1xf32> to vector<1x1x1xf32>
      %381 = vector.extract %380[0, 0, 0] : f32 from vector<1x1x1xf32>
      %c0_274 = arith.constant 0 : index
      %382 = memref.load %arg5[%c0_274] : memref<6xf32, #tpu.memory_space<smem>>
      memref.store %381, %arg5[%c0_274] : memref<6xf32, #tpu.memory_space<smem>>
      %c1_275 = arith.constant 1 : index
      %c0_276 = arith.constant 0 : index
      %c0_277 = arith.constant 0 : index
      %383 = vector.load %arg6[%c1_275, %c0_276, %c0_277] : memref<6x8x128xf32, #tpu.memory_space<vmem>>, vector<1x8x128xf32>
      %384 = vector.shape_cast %383 : vector<1x8x128xf32> to vector<8x128xf32>
      %385 = vector.shape_cast %384 : vector<8x128xf32> to vector<1x8x128xf32>
      %cst_278 = arith.constant dense<0.000000e+00> : vector<1xf32>
      %386 = vector.multi_reduction <add>, %385, %cst_278 [1, 2] : vector<1x8x128xf32> to vector<1xf32>
      %387 = vector.shape_cast %386 : vector<1xf32> to vector<1x1x1xf32>
      %388 = vector.extract %387[0, 0, 0] : f32 from vector<1x1x1xf32>
      %c1_279 = arith.constant 1 : index
      %389 = memref.load %arg5[%c1_279] : memref<6xf32, #tpu.memory_space<smem>>
      memref.store %388, %arg5[%c1_279] : memref<6xf32, #tpu.memory_space<smem>>
      %c2_280 = arith.constant 2 : index
      %c0_281 = arith.constant 0 : index
      %c0_282 = arith.constant 0 : index
      %390 = vector.load %arg6[%c2_280, %c0_281, %c0_282] : memref<6x8x128xf32, #tpu.memory_space<vmem>>, vector<1x8x128xf32>
      %391 = vector.shape_cast %390 : vector<1x8x128xf32> to vector<8x128xf32>
      %392 = vector.shape_cast %391 : vector<8x128xf32> to vector<1x8x128xf32>
      %cst_283 = arith.constant dense<0.000000e+00> : vector<1xf32>
      %393 = vector.multi_reduction <add>, %392, %cst_283 [1, 2] : vector<1x8x128xf32> to vector<1xf32>
      %394 = vector.shape_cast %393 : vector<1xf32> to vector<1x1x1xf32>
      %395 = vector.extract %394[0, 0, 0] : f32 from vector<1x1x1xf32>
      %c2_284 = arith.constant 2 : index
      %396 = memref.load %arg5[%c2_284] : memref<6xf32, #tpu.memory_space<smem>>
      memref.store %395, %arg5[%c2_284] : memref<6xf32, #tpu.memory_space<smem>>
      %c3_285 = arith.constant 3 : index
      %c0_286 = arith.constant 0 : index
      %c0_287 = arith.constant 0 : index
      %397 = vector.load %arg6[%c3_285, %c0_286, %c0_287] : memref<6x8x128xf32, #tpu.memory_space<vmem>>, vector<1x8x128xf32>
      %398 = vector.shape_cast %397 : vector<1x8x128xf32> to vector<8x128xf32>
      %399 = vector.shape_cast %398 : vector<8x128xf32> to vector<1x8x128xf32>
      %cst_288 = arith.constant dense<0.000000e+00> : vector<1xf32>
      %400 = vector.multi_reduction <add>, %399, %cst_288 [1, 2] : vector<1x8x128xf32> to vector<1xf32>
      %401 = vector.shape_cast %400 : vector<1xf32> to vector<1x1x1xf32>
      %402 = vector.extract %401[0, 0, 0] : f32 from vector<1x1x1xf32>
      %c3_289 = arith.constant 3 : index
      %403 = memref.load %arg5[%c3_289] : memref<6xf32, #tpu.memory_space<smem>>
      memref.store %402, %arg5[%c3_289] : memref<6xf32, #tpu.memory_space<smem>>
      %c4_290 = arith.constant 4 : index
      %c0_291 = arith.constant 0 : index
      %c0_292 = arith.constant 0 : index
      %404 = vector.load %arg6[%c4_290, %c0_291, %c0_292] : memref<6x8x128xf32, #tpu.memory_space<vmem>>, vector<1x8x128xf32>
      %405 = vector.shape_cast %404 : vector<1x8x128xf32> to vector<8x128xf32>
      %406 = vector.shape_cast %405 : vector<8x128xf32> to vector<1x8x128xf32>
      %cst_293 = arith.constant dense<0.000000e+00> : vector<1xf32>
      %407 = vector.multi_reduction <add>, %406, %cst_293 [1, 2] : vector<1x8x128xf32> to vector<1xf32>
      %408 = vector.shape_cast %407 : vector<1xf32> to vector<1x1x1xf32>
      %409 = vector.extract %408[0, 0, 0] : f32 from vector<1x1x1xf32>
      %c4_294 = arith.constant 4 : index
      %410 = memref.load %arg5[%c4_294] : memref<6xf32, #tpu.memory_space<smem>>
      memref.store %409, %arg5[%c4_294] : memref<6xf32, #tpu.memory_space<smem>>
      %c5_295 = arith.constant 5 : index
      %c0_296 = arith.constant 0 : index
      %c0_297 = arith.constant 0 : index
      %411 = vector.load %arg6[%c5_295, %c0_296, %c0_297] : memref<6x8x128xf32, #tpu.memory_space<vmem>>, vector<1x8x128xf32>
      %412 = vector.shape_cast %411 : vector<1x8x128xf32> to vector<8x128xf32>
      %413 = vector.shape_cast %412 : vector<8x128xf32> to vector<1x8x128xf32>
      %cst_298 = arith.constant dense<0.000000e+00> : vector<1xf32>
      %414 = vector.multi_reduction <add>, %413, %cst_298 [1, 2] : vector<1x8x128xf32> to vector<1xf32>
      %415 = vector.shape_cast %414 : vector<1xf32> to vector<1x1x1xf32>
      %416 = vector.extract %415[0, 0, 0] : f32 from vector<1x1x1xf32>
      %c5_299 = arith.constant 5 : index
      %417 = memref.load %arg5[%c5_299] : memref<6xf32, #tpu.memory_space<smem>>
      memref.store %416, %arg5[%c5_299] : memref<6xf32, #tpu.memory_space<smem>>
    } else {
    }
    return
  }
  func.func @transform_0(%arg0: i32, %arg1: i32) -> i32 {
    %c0_i32 = arith.constant 0 : i32
    %c0_i32_0 = arith.constant 0 : i32
    return %c0_i32 : i32
  }
  func.func @transform_1(%arg0: i32, %arg1: i32) -> (i32, i32, i32, i32) {
    %c0_i32 = arith.constant 0 : i32
    %c0_i32_0 = arith.constant 0 : i32
    %c0_i32_1 = arith.constant 0 : i32
    return %c0_i32, %arg0, %arg1, %c0_i32_0 : i32, i32, i32, i32
  }
  func.func @transform_2(%arg0: i32, %arg1: i32) -> (i32, i32, i32, i32) {
    %c0_i32 = arith.constant 0 : i32
    %c0_i32_0 = arith.constant 0 : i32
    %c0_i32_1 = arith.constant 0 : i32
    return %c0_i32, %arg0, %arg1, %c0_i32_0 : i32, i32, i32, i32
  }
  func.func @transform_3(%arg0: i32, %arg1: i32) -> i32 {
    %c0_i32 = arith.constant 0 : i32
    %c0_i32_0 = arith.constant 0 : i32
    return %c0_i32 : i32
  }
}

</mosaic_0001>

<bundles_post_ra>
// kernel: yolo_loss_pallas.1
= control target key start
LH: loop header
LB: loop body
LE: loop exit
PB: predicated region body
PF: predicated region fallthrough
CT: control target
= control target key end

     0   :  { %8 = vsyncpa [#allocation4], 0  ;;  %s1489_s0 = inlined_call_operand.vmem [shape: f32[12], index: 0, kind: input, shape index: {}]   ;;  %s1490_s1 = inlined_call_operand.vmem [shape: f32[16,3,8,128], index: 1, kind: input, shape index: {}]   ;;  %s1491_s2 = inlined_call_operand.vmem [shape: f32[16,3,8,128], index: 2, kind: input, shape index: {}]   ;;  %s1492_s3 = inlined_call_operand.vmem [shape: f32[6], index: 3, kind: output, shape index: {}]  }
   0x1   :  { %9 = vsyncpa [#allocation5], 0  ;;  %s1153_s12 = smov 0   ;;  %s1155_s13 = smov 0  }
   0x2   :  { %s1157_s14 = smov 0   ;;  %s1159_s15 = smov 0  }
   0x3   :  { %s1161_s16 = smov 0  }
   0x4 LB: > { %s878_s17 = sadd.s32 4294967295, %s1127_s16   ;;  %s27_s18 = sadd.s32 1, %s1123_s15  ;;  %s1127_s16 = sphi %s1161_s16, %s15_s16   ;;  %s1123_s15 = sphi %s1159_s15, %s1499_s15   ;;  %s1119_s14 = sphi %s1157_s14, %s1498_s14   ;;  %s1115_s13 = sphi %s1155_s13, %s1497_s13   ;;  %s1111_s12 = sphi %s1153_s12, %s1496_s12  }
   0x5   : > { %p29_p0 = scmp.ge.s32.totalorder %s27_s18, 3  ;;  %s57_s19 = sadd.s32 1, %s1115_s13 }
   0x6   : > { %p64_p1 = scmp.ne.s32.totalorder %s1115_s13, %s1111_s12  ;;  %p65_p2 = scmp.eq.s32.totalorder %s1127_s16, 0 }
   0x7   : > { %s1501_s18 = smov (%p29_p0, %s27_s18), 0  ;;  %p879_p4 = scmp.ge.s32.totalorder %s1127_s16, 1 }
   0x8   : > { %p1186_p3 = por %p65_p2, %p64_p1  ;;  %s52_s21 = ssub.s32 %s1123_s15, %s1501_s18 }
   0x9   : > { %p130_p5 = scmp.lt.s32.totalorder %s1127_s16, 4  ;;  %p55_p6 = scmp.eq.s32.totalorder %s52_s21, 0 }
   0xa   : > { %p1200_p8 = scmp.eq.s32.totalorder %s878_s17, 0  ;;  %s142_s27 = sshll.u32 %s1489_s0, 4  ;;  %s143_s27 = int_to_ptr.vmem [resolvable:$true] %s142_s27 }
   0xb   : > { %p1194_p7 = pnand %p879_p4, %p130_p5  ;;  %s1129_s28 = smov [#allocation3]  }
   0xc   : > { %s1205_s24 = scalar_select %p55_p6, %s1115_s13, %s57_s19  }
   0xd   : > { %p952_p9 = pneg %p1194_p7  ;;  %p881_p11 = scmp.ge.s32.totalorder %s1127_s16, 3 }
   0xf   : > { %p953_p10 = pnand %p1200_p8, %p952_p9  ;;  %149 = sbr.rel (%p881_p11) target bundleno = 60 (0x3c), region = 20 }
  0x11   : > { %955 = dma.vmem_to_smem (!%p953_p10), %s143_s27, 16, %s1129_s28, [#allocation4]  }
  0x14   : > { %152 = sbr.rel (!%p1186_p3) target bundleno = 40 (0x28), region = 24  ;;  %s154_s29 = sand.u32 (%p1186_p3), 1, %s1115_s13  }
  0x15   : > { %s883_s30 = sshll.u32 (%p1186_p3), %s1123_s15, 3  ;;  %s882_s4 = sshll.u32 (%p1186_p3), %s154_s29, 7 }
  0x16   : > { %s1222_s7 = scalar_lea.vmem (%p1186_p3), %s1490_s1, %s883_s30  ;;  %s156_s8 = scalar_lea.vmem (%p1186_p3), [#allocation6], %s882_s4 }
  0x17   : > { %v218_v0 = vld [vmem:[%s1222_s7] sm:$0xff] (%p1186_p3)  ;;  %v220_v1 = vld [vmem:[%s1222_s7 + $0x18] sm:$0xff] (%p1186_p3)  ;;  %v222_v2 = vld [vmem:[%s1222_s7 + $0x30] sm:$0xff] (%p1186_p3) }
  0x18   : > { %219 = vst [vmem:[%s156_s8] sm:$0xff] (%p1186_p3), %v218_v0  ;;  %v224_v3 = vld [vmem:[%s1222_s7 + $0x48] sm:$0xff] (%p1186_p3)  ;;  %v226_v4 = vld [vmem:[%s1222_s7 + $0x60] sm:$0xff] (%p1186_p3)  ;;  %v228_v5 = vld [vmem:[%s1222_s7 + $0x78] sm:$0xff] (%p1186_p3) }
  0x19   : > { %221 = vst [vmem:[%s156_s8 + $0x8] sm:$0xff] %v220_v1  ;;  %v230_v6 = vld [vmem:[%s1222_s7 + $0x90] sm:$0xff]  ;;  %v232_v7 = vld [vmem:[%s1222_s7 + $0xa8] sm:$0xff]  ;;  %v234_v8 = vld [vmem:[%s1222_s7 + $0xc0] sm:$0xff] }
  0x1a   : > { %223 = vst [vmem:[%s156_s8 + $0x10] sm:$0xff] %v222_v2  ;;  %v236_v9 = vld [vmem:[%s1222_s7 + $0xd8] sm:$0xff]  ;;  %v238_v10 = vld [vmem:[%s1222_s7 + $0xf0] sm:$0xff]  ;;  %v240_v11 = vld [vmem:[%s1222_s7 + $0x108] sm:$0xff] }
  0x1b   : > { %225 = vst [vmem:[%s156_s8 + $0x18] sm:$0xff] %v224_v3  ;;  %v242_v12 = vld [vmem:[%s1222_s7 + $0x120] sm:$0xff]  ;;  %v244_v13 = vld [vmem:[%s1222_s7 + $0x138] sm:$0xff]  ;;  %v246_v14 = vld [vmem:[%s1222_s7 + $0x150] sm:$0xff] }
  0x1c   : > { %227 = vst [vmem:[%s156_s8 + $0x20] sm:$0xff] %v226_v4  ;;  %v248_v15 = vld [vmem:[%s1222_s7 + $0x168] sm:$0xff] }
  0x1d   : > { %229 = vst [vmem:[%s156_s8 + $0x28] sm:$0xff] %v228_v5 }
  0x1e   : > { %231 = vst [vmem:[%s156_s8 + $0x30] sm:$0xff] %v230_v6 }
  0x1f   : > { %233 = vst [vmem:[%s156_s8 + $0x38] sm:$0xff] %v232_v7 }
  0x20   : > { %235 = vst [vmem:[%s156_s8 + $0x40] sm:$0xff] %v234_v8 }
  0x21   : > { %237 = vst [vmem:[%s156_s8 + $0x48] sm:$0xff] %v236_v9 }
  0x22   : > { %239 = vst [vmem:[%s156_s8 + $0x50] sm:$0xff] %v238_v10 }
  0x23   : > { %241 = vst [vmem:[%s156_s8 + $0x58] sm:$0xff] %v240_v11 }
  0x24   : > { %243 = vst [vmem:[%s156_s8 + $0x60] sm:$0xff] %v242_v12 }
  0x25   : > { %245 = vst [vmem:[%s156_s8 + $0x68] sm:$0xff] %v244_v13 }
  0x26   : > { %247 = vst [vmem:[%s156_s8 + $0x70] sm:$0xff] %v246_v14 }
  0x27   : > { %249 = vst [vmem:[%s156_s8 + $0x78] sm:$0xff] %v248_v15 }
  0x28 PF: > { %255 = sbr.rel (!%p1186_p3) target bundleno = 60 (0x3c), region = 62  ;;  %s257_s9 = sand.u32 (%p1186_p3), 1, %s1115_s13  }
  0x29   : > { %s885_s10 = sshll.u32 (%p1186_p3), %s1123_s15, 3  ;;  %s884_s11 = sshll.u32 (%p1186_p3), %s257_s9, 7 }
  0x2a   : > { %s1247_s25 = scalar_lea.vmem (%p1186_p3), %s1491_s2, %s885_s10  ;;  %s259_s20 = scalar_lea.vmem (%p1186_p3), [#allocation7], %s884_s11 }
  0x2b   : > { %v321_v16 = vld [vmem:[%s1247_s25] sm:$0xff] (%p1186_p3)  ;;  %v323_v17 = vld [vmem:[%s1247_s25 + $0x18] sm:$0xff] (%p1186_p3)  ;;  %v325_v18 = vld [vmem:[%s1247_s25 + $0x30] sm:$0xff] (%p1186_p3) }
  0x2c   : > { %322 = vst [vmem:[%s259_s20] sm:$0xff] (%p1186_p3), %v321_v16  ;;  %v327_v19 = vld [vmem:[%s1247_s25 + $0x48] sm:$0xff] (%p1186_p3)  ;;  %v329_v20 = vld [vmem:[%s1247_s25 + $0x60] sm:$0xff] (%p1186_p3)  ;;  %v331_v21 = vld [vmem:[%s1247_s25 + $0x78] sm:$0xff] (%p1186_p3) }
  0x2d   : > { %324 = vst [vmem:[%s259_s20 + $0x8] sm:$0xff] %v323_v17  ;;  %v333_v22 = vld [vmem:[%s1247_s25 + $0x90] sm:$0xff]  ;;  %v335_v23 = vld [vmem:[%s1247_s25 + $0xa8] sm:$0xff]  ;;  %v337_v24 = vld [vmem:[%s1247_s25 + $0xc0] sm:$0xff] }
  0x2e   : > { %326 = vst [vmem:[%s259_s20 + $0x10] sm:$0xff] %v325_v18  ;;  %v339_v25 = vld [vmem:[%s1247_s25 + $0xd8] sm:$0xff]  ;;  %v341_v26 = vld [vmem:[%s1247_s25 + $0xf0] sm:$0xff]  ;;  %v343_v27 = vld [vmem:[%s1247_s25 + $0x108] sm:$0xff] }
  0x2f   : > { %328 = vst [vmem:[%s259_s20 + $0x18] sm:$0xff] %v327_v19  ;;  %v345_v28 = vld [vmem:[%s1247_s25 + $0x120] sm:$0xff]  ;;  %v347_v29 = vld [vmem:[%s1247_s25 + $0x138] sm:$0xff]  ;;  %v349_v30 = vld [vmem:[%s1247_s25 + $0x150] sm:$0xff] }
  0x30   : > { %330 = vst [vmem:[%s259_s20 + $0x20] sm:$0xff] %v329_v20  ;;  %v351_v31 = vld [vmem:[%s1247_s25 + $0x168] sm:$0xff] }
  0x31   : > { %332 = vst [vmem:[%s259_s20 + $0x28] sm:$0xff] %v331_v21 }
  0x32   : > { %334 = vst [vmem:[%s259_s20 + $0x30] sm:$0xff] %v333_v22 }
  0x33   : > { %336 = vst [vmem:[%s259_s20 + $0x38] sm:$0xff] %v335_v23 }
  0x34   : > { %338 = vst [vmem:[%s259_s20 + $0x40] sm:$0xff] %v337_v24 }
  0x35   : > { %340 = vst [vmem:[%s259_s20 + $0x48] sm:$0xff] %v339_v25 }
  0x36   : > { %342 = vst [vmem:[%s259_s20 + $0x50] sm:$0xff] %v341_v26 }
  0x37   : > { %344 = vst [vmem:[%s259_s20 + $0x58] sm:$0xff] %v343_v27 }
  0x38   : > { %346 = vst [vmem:[%s259_s20 + $0x60] sm:$0xff] %v345_v28 }
  0x39   : > { %348 = vst [vmem:[%s259_s20 + $0x68] sm:$0xff] %v347_v29 }
  0x3a   : > { %350 = vst [vmem:[%s259_s20 + $0x70] sm:$0xff] %v349_v30 }
  0x3b   : > { %352 = vst [vmem:[%s259_s20 + $0x78] sm:$0xff] %v351_v31 }
  0x3c PF: > { %361 = sbr.rel (%p1194_p7) target bundleno = 378 (0x17a), region = 100 }
  0x41   : > { %1102 = dma.done.wait (%p1200_p8), [#allocation4], 16  }
  0x42   : > { %1104 = vsyncadd (%p1200_p8), [#allocation4], 4294967280  ;;  %s369_s26 = sand.u32 1, %s1111_s12  }
  0x43   : > { %s888_s27 = sshll.u32 %s369_s26, 7 }
  0x44   : > { %s1272_s28 = scalar_lea.vmem [#allocation6], %s888_s27  ;;  %s1274_s29 = scalar_lea.vmem [#allocation7], %s888_s27 }
  0x45   : > { %382 = sfence }
  0x46   : > { %p399_p12 = scmp.eq.s32.totalorder %s1119_s14, 0 }
  0x47   : > { %v1130_v32 = vmov (%p399_p12), 0.0  }
  0x48   : > { %404 = sbr.rel (!%p399_p12) target bundleno = 78 (0x4e), region = 116  ;;  %405 = vst [vmem:[#allocation2 + $0x28] sm:$0xff] (%p399_p12), %v1130_v32 }
  0x49   : > { %406 = vst [vmem:[#allocation2 + $0x10] sm:$0xff] (%p399_p12), %v1130_v32 }
  0x4a   : > { %407 = vst [vmem:[#allocation2 + $0x8] sm:$0xff] (%p399_p12), %v1130_v32 }
  0x4b   : > { %408 = vst [vmem:[#allocation2] sm:$0xff] (%p399_p12), %v1130_v32 }
  0x4c   : > { %409 = vst [vmem:[#allocation2 + $0x18] sm:$0xff] (%p399_p12), %v1130_v32 }
  0x4d   : > { %410 = vst [vmem:[#allocation2 + $0x20] sm:$0xff] %v1130_v32 }
  0x4e PF: > { %v411_v33 = vlaneseq  ;;  %v1278_v34 = vld [vmem:[%s1272_s28] sm:$0xff]  ;;  %v1281_v35 = vld [vmem:[%s1274_s29 + $0x8] sm:$0xff]  ;;  %s1284_s12 = sshll.u32 %s1119_s14, 1  ;;  %p707_p13 = scmp.eq.s32.totalorder %s1119_s14, 2  ;;  %v901_v39 = vld [vmem:[%s1274_s29 + $0x18] sm:$0xff]  ;;  %v1131_v40 = vmov 0.0  }
  0x4f   : > { %vm439_vm0 = vcmp.eq.f32.partialorder %v1281_v35, 0.0  ;;  %v443_v36 = vand.u32 2147483647, %v1278_v34  ;;  %s1292_s22 = sld [smem:[#allocation3 + %s1284_s12]]  ;;  %s425_s23 = sadd.s32 1, %s1284_s12  ;;  %v896_v43 = vld [vmem:[%s1272_s28 + $0x8] sm:$0xff] }
  0x50   : > { %v412_v37 = vshrl.u32 %v411_v33, 7  ;;  %v414_v38 = vand.u32 127, %v411_v33  ;;  %v895_v41 = vsel %vm439_vm0, 1.0, %v1131_v40  ;;  %s1296_s30 = sld [smem:[#allocation3 + %s425_s23]]  ;;  %v897_v45 = vld [vmem:[%s1272_s28 + $0x10] sm:$0xff]  ;;  %v1300_v46 = vld [vmem:[%s1272_s28 + $0x18] sm:$0xff] }
  0x51   : > { %v444_v42 = vsub.f32 0.0, %v443_v36  ;;  %v1303_v47 = vld [vmem:[%s1272_s28 + $0x20] sm:$0xff]  ;;  %v472_v48 = vsub.f32 0.0, %v896_v43  ;;  %v492_v50 = vmul.f32 0.5, %v901_v39  ;;  %s427_s4 = sadd.s32 6, %s1284_s12  ;;  %s429_s5 = sadd.s32 7, %s1284_s12 }
  0x52   : > { %v418_v44 = vmul.u32 128, %v412_v37  ;;  %v902_v51 = vld [vmem:[%s1274_s29 + $0x20] sm:$0xff]  ;;  %v477_v54 = vsub.f32 0.0, %v897_v45  ;;  %v482_v55 = vmul.f32 1.442695, %v1300_v46  ;;  %s1309_s6 = sld [smem:[#allocation3 + %s427_s4]] }
  0x53   : > { %v445_v49 = vmul.f32 1.442695, %v444_v42  ;;  %v473_v53 = vmul.f32 1.442695, %v472_v48  ;;  %v486_v56 = vmul.f32 1.442695, %v1303_v47  ;;  %v1335_v4 = vsub.f32 %v1281_v35, %v492_v50 }
  0x54   : > { %v419_v52 = vadd.s32 %v418_v44, %v414_v38  ;;  %v493_v57 = vmul.f32 0.5, %v902_v51  ;;  %s1312_s7 = sld [smem:[#allocation3 + %s429_s5]]  ;;  %v1315_v58 = vld [vmem:[%s1272_s28 + $0x28] sm:$0xff]  ;;  %v1318_v59 = vld [vmem:[%s1272_s28 + $0x30] sm:$0xff]  ;;  %v478_v60 = vmul.f32 1.442695, %v477_v54  ;;  %v1338_v5 = vadd.f32 %v1281_v35, %v492_v50 }
  0x55   : > { %1004 = vpow2.f32 %v445_v49  ;;  %v552_v61 = vmax.f32 %v1315_v58, %v1318_v59  ;;  %v1323_v62 = vld [vmem:[%s1272_s28 + $0x38] sm:$0xff]  ;;  %v685_v0 = vld [vmem:[#allocation2 + $0x10] sm:$0xff]  ;;  %v1327_v1 = vld [vmem:[%s1274_s29 + $0x10] sm:$0xff]  ;;  %v447_v18 = vmax.f32 %v1278_v34, 0.0  ;;  %v484_v20 = vstv %s1292_s22 }
  0x56   : > { %vm420_vm1 = vcmp.lt.s32.totalorder %v419_v52, 128  ;;  %1006 = vpow2.f32 %v473_v53  ;;  %v1332_v3 = vld [vmem:[%s1272_s28 + $0x40] sm:$0xff]  ;;  %v1346_v9 = vsub.f32 %v1327_v1, %v493_v57  ;;  %v1349_v10 = vadd.f32 %v1327_v1, %v493_v57  ;;  %v1353_v12 = vld [vmem:[%s1272_s28 + $0x48] sm:$0xff]  ;;  %v1366_v22 = vld [vmem:[%s1272_s28 + $0x50] sm:$0xff] }
  0x57   : > { %v891_v63 = vsel %vm420_vm1, 1.0, %v1131_v40  ;;  %1008 = vpow2.f32 %v482_v55  ;;  %v555_v6 = vmax.f32 %v552_v61, %v1323_v62  ;;  %v1342_v7 = vld [vmem:[%s1274_s29] sm:$0xff]  ;;  %v488_v26 = vstv %s1296_s30  ;;  %v1378_v32 = vld [vmem:[%s1272_s28 + $0x58] sm:$0xff]  ;;  %v1392_v55 = vld [vmem:[%s1272_s28 + $0x68] sm:$0xff] }
  0x58   : > { %v1329_v2 = vmul.f32 %v895_v41, %v891_v63  ;;  %1010 = vpow2.f32 %v478_v60  ;;  %v527_v11 = vstv %s1309_s6  ;;  %vm435_vm2 = vcmp.eq.f32.partialorder %v1342_v7, 1.0  ;;  %v1383_v43 = vld [vmem:[%s1272_s28 + $0x60] sm:$0xff]  ;;  %v694_v60 = vld [vmem:[#allocation2] sm:$0xff] }
  0x59   : > { %1012 = vpow2.f32 %v486_v56  ;;  %v528_v14 = vmul.f32 %v901_v39, %v527_v11  ;;  %v558_v16 = vmax.f32 %v555_v6, %v1332_v3  ;;  %v448_v24 = vmul.f32 %v1342_v7, %v1278_v34 }
  0x5a   : > { %v686_v8 = vadd.f32 %v685_v0, %v1329_v2  ;;  %v532_v15 = vstv %s1312_s7  ;;  %v515_v29 = vsub.f32 %v1338_v5, %v1335_v4  ;;  %v516_v30 = vsub.f32 %v1349_v10, %v1346_v9 }
  0x5b   : > { %v1355_v13 = vpop.eup %1004  ;;  %v533_v21 = vmul.f32 %v902_v51, %v532_v15  ;;  %v561_v27 = vmax.f32 %v558_v16, %v1353_v12  ;;  %v529_v31 = vadd.f32 1e-16, %v528_v14  ;;  %v894_v44 = vsel %vm435_vm2, 1.0, %v1131_v40  ;;  %v680_v14 = vld [vmem:[#allocation2 + $0x28] sm:$0xff] }
  0x5c   : > { %v1007_v17 = vpop.eup %1006  ;;  %v1362_v19 = vadd.f32 1.0, %v1355_v13  ;;  %687 = vst [vmem:[#allocation2 + $0x10] sm:$0xff] %v686_v8  ;;  %v517_v45 = vmul.f32 %v516_v30, %v515_v29  ;;  %v449_v48 = vsub.f32 %v447_v18, %v448_v24  ;;  %v1389_v53 = vmul.f32 %v894_v44, %v891_v63  ;;  %v1403_v29 = vld [vmem:[%s1272_s28 + $0x70] sm:$0xff] }
  0x5d   : > { %v1009_v23 = vpop.eup %1008  ;;  %v475_v25 = vadd.f32 1.0, %v1007_v17  ;;  %v534_v38 = vadd.f32 1e-16, %v533_v21  ;;  %v564_v39 = vmax.f32 %v561_v27, %v1366_v22  ;;  %vm455_vm3 = vcmp.ge.f32.partialorder %v1278_v34, 0.0 }
  0x5e   : > { %v1011_v28 = vpop.eup %1010  ;;  %1014 = vlog2.f32 %v1362_v19  ;;  %v485_v37 = vmul.f32 %v1009_v23, %v484_v20  ;;  %v518_v57 = vand.u32 2147483647, %v517_v45  ;;  %v695_v8 = vadd.f32 %v694_v60, %v1389_v53 }
  0x5f   : > { %v1013_v33 = vpop.eup %1012  ;;  %v480_v36 = vadd.f32 1.0, %v1011_v28  ;;  %1016 = vrcp.f32 %v475_v25  ;;  %v567_v42 = vmax.f32 %v564_v39, %v1378_v32 }
  0x60   : > { %v489_v41 = vmul.f32 %v1013_v33, %v488_v26  ;;  %v490_v49 = vmul.f32 0.5, %v485_v37  ;;  %696 = vst [vmem:[#allocation2] sm:$0xff] %v695_v8  ;;  %v1408_v37 = vld [vmem:[%s1272_s28 + $0x78] sm:$0xff] }
  0x61   : > { %1018 = vrcp.f32 %v480_v36  ;;  %v570_v52 = vmax.f32 %v567_v42, %v1383_v43 }
  0x62   : > { %1020 = vlog2.f32 %v529_v31  ;;  %v491_v51 = vmul.f32 0.5, %v489_v41 }
  0x63   : > { %1022 = vlog2.f32 %v534_v38  ;;  %v573_v17 = vmax.f32 %v570_v52, %v1392_v55 }
  0x64   : > { %v1015_v50 = vpop.eup %1014  ;;  %1024 = vrcp.f32 %v1362_v19 }
  0x65   : > { %v452_v54 = vmul.f32 0.6931472, %v1015_v50  ;;  %v1017_v56 = vpop.eup %1016  ;;  %v576_v39 = vmax.f32 %v573_v17, %v1403_v29 }
  0x66   : > { %v494_v40 = vsub.f32 %v1017_v56, %v490_v49  ;;  %v495_v6 = vadd.f32 %v1017_v56, %v490_v49  ;;  %v537_v63 = vsub.f32 %v1017_v56, %v1281_v35 }
  0x67   : > { %v1019_v61 = vpop.eup %1018  ;;  %v453_v0 = vadd.f32 %v452_v54, %v449_v48 }
  0x68   : > { %v1021_v11 = vpop.eup %1020  ;;  %v496_v15 = vsub.f32 %v1019_v61, %v491_v51  ;;  %v497_v16 = vadd.f32 %v1019_v61, %v491_v51  ;;  %v502_v21 = vmin.f32 %v495_v6, %v1338_v5  ;;  %v503_v23 = vmax.f32 %v494_v40, %v1335_v4 }
  0x69   : > { %v1023_v18 = vpop.eup %1022  ;;  %v681_v20 = vmul.f32 %v453_v0, %v1329_v2  ;;  %v511_v24 = vsub.f32 %v495_v6, %v494_v40  ;;  %v531_v28 = vmul.f32 0.6931472, %v1021_v11  ;;  %v538_v2 = vsub.f32 %v1019_v61, %v1327_v1  ;;  %v698_v40 = vld [vmem:[#allocation2 + $0x18] sm:$0xff] }
  0x6a   : > { %v506_v25 = vmin.f32 %v497_v16, %v1349_v10  ;;  %v507_v26 = vmax.f32 %v496_v15, %v1346_v9  ;;  %v512_v27 = vsub.f32 %v497_v16, %v496_v15  ;;  %v504_v30 = vsub.f32 %v502_v21, %v503_v23  ;;  %v1025_v15 = vpop.eup %1024 }
  0x6b   : > { %v682_v35 = vadd.f32 %v681_v20, %v680_v14  ;;  %v536_v31 = vmul.f32 0.6931472, %v1023_v18  ;;  %v539_v4 = vsub.f32 %v1300_v46, %v531_v28  ;;  %v541_v36 = vmul.f32 %v537_v63, %v537_v63 }
  0x6c   : > { %v508_v33 = vsub.f32 %v506_v25, %v507_v26  ;;  %v513_v5 = vmul.f32 %v512_v27, %v511_v24  ;;  %v505_v10 = vmax.f32 %v504_v30, 0.0  ;;  %v542_v38 = vmul.f32 %v538_v2, %v538_v2 }
  0x6d   : > { %683 = vst [vmem:[#allocation2 + $0x28] sm:$0xff] %v682_v35  ;;  %v540_v9 = vsub.f32 %v1303_v47, %v536_v31  ;;  %v544_v44 = vmul.f32 %v539_v4, %v539_v4  ;;  %v1413_v1 = vmax.f32 %v576_v39, %v1408_v37  ;;  %v456_v21 = vmul.f32 %v1025_v15, %v1355_v13 }
  0x6e   : > { %v509_v41 = vmax.f32 %v508_v33, 0.0  ;;  %v514_v42 = vand.u32 2147483647, %v513_v5  ;;  %v543_v45 = vadd.f32 %v542_v38, %v541_v36 }
  0x6f   : > { %v546_v48 = vmul.f32 %v540_v9, %v540_v9  ;;  %v580_v51 = vsub.f32 %v1315_v58, %v1413_v1  ;;  %v583_v47 = vsub.f32 %v1318_v59, %v1413_v1  ;;  %v587_v52 = vsub.f32 %v1323_v62, %v1413_v1 }
  0x70   : > { %v510_v46 = vmul.f32 %v509_v41, %v505_v10  ;;  %v519_v49 = vadd.f32 %v518_v57, %v514_v42  ;;  %v545_v50 = vadd.f32 %v544_v44, %v543_v45  ;;  %v591_v56 = vsub.f32 %v1332_v3, %v1413_v1  ;;  %v689_v45 = vld [vmem:[#allocation2 + $0x8] sm:$0xff] }
  0x71   : > { %v581_v61 = vmul.f32 1.442695, %v580_v51  ;;  %v584_v0 = vmul.f32 1.442695, %v583_v47  ;;  %v595_v19 = vsub.f32 %v1353_v12, %v1413_v1  ;;  %v588_v6 = vmul.f32 1.442695, %v587_v52 }
  0x72   : > { %v520_v54 = vsub.f32 %v519_v49, %v510_v46  ;;  %v547_v60 = vadd.f32 %v546_v48, %v545_v50  ;;  %v592_v11 = vmul.f32 1.442695, %v591_v56  ;;  %v599_v14 = vsub.f32 %v1366_v22, %v1413_v1 }
  0x73   : > { %1026 = vpow2.f32 %v581_v61  ;;  %v596_v63 = vmul.f32 1.442695, %v595_v19  ;;  %v603_v17 = vsub.f32 %v1378_v32, %v1413_v1  ;;  %v607_v20 = vsub.f32 %v1383_v43, %v1413_v1 }
  0x74   : > { %v521_v57 = vadd.f32 1e-06, %v520_v54  ;;  %v699_v8 = vmul.f32 %v547_v60, %v1389_v53  ;;  %v600_v18 = vmul.f32 1.442695, %v599_v14  ;;  %v611_v25 = vsub.f32 %v1392_v55, %v1413_v1  ;;  %v916_v14 = vld [vmem:[%s1274_s29 + $0x38] sm:$0xff] }
  0x75   : > { %v604_v24 = vmul.f32 1.442695, %v603_v17  ;;  %v608_v35 = vmul.f32 1.442695, %v607_v20  ;;  %v615_v30 = vsub.f32 %v1403_v29, %v1413_v1  ;;  %v457_v2 = vsel %vm455_vm3, %v1025_v15, %v456_v21 }
  0x76   : > { %1028 = vrcp.f32 %v521_v57  ;;  %v700_v16 = vadd.f32 %v699_v8, %v698_v40  ;;  %v612_v34 = vmul.f32 1.442695, %v611_v25  ;;  %v619_v4 = vsub.f32 %v1408_v37, %v1413_v1  ;;  %v914_v8 = vld [vmem:[%s1274_s29 + $0x28] sm:$0xff] }
  0x77   : > { %1030 = vpow2.f32 %v584_v0  ;;  %v616_v38 = vmul.f32 1.442695, %v615_v30 }
  0x78   : > { %1032 = vpow2.f32 %v588_v6  ;;  %701 = vst [vmem:[#allocation2 + $0x18] sm:$0xff] %v700_v16  ;;  %v620_v44 = vmul.f32 1.442695, %v619_v4 }
  0x79   : > { %1034 = vpow2.f32 %v592_v11  ;;  %v1027_v23 = vpop.eup %1026  ;;  %v915_v11 = vld [vmem:[%s1274_s29 + $0x30] sm:$0xff] }
  0x7a   : > { %1036 = vpow2.f32 %v596_v63 }
  0x7b   : > { %1038 = vpow2.f32 %v600_v18  ;;  %v917_v18 = vld [vmem:[%s1274_s29 + $0x40] sm:$0xff] }
  0x7c   : > { %v1029_v26 = vpop.eup %1028  ;;  %1040 = vpow2.f32 %v604_v24  ;;  %v918_v24 = vld [vmem:[%s1274_s29 + $0x48] sm:$0xff] }
  0x7d   : > { %v1031_v27 = vpop.eup %1030  ;;  %v523_v28 = vmul.f32 %v1029_v26, %v510_v46  ;;  %1042 = vpow2.f32 %v608_v35 }
  0x7e   : > { %v1033_v31 = vpop.eup %1032  ;;  %v586_v33 = vadd.f32 %v1031_v27, %v1027_v23  ;;  %1044 = vpow2.f32 %v612_v34  ;;  %v919_v27 = vld [vmem:[%s1274_s29 + $0x50] sm:$0xff] }
  0x7f   : > { %v1035_v13 = vpop.eup %1034  ;;  %v524_v5 = vmul.f32 %v523_v28, %v1342_v7  ;;  %1046 = vpow2.f32 %v616_v38  ;;  %v924_v38 = vld [vmem:[%s1274_s29 + $0x78] sm:$0xff] }
  0x80   : > { %v590_v36 = vadd.f32 %v1033_v31, %v586_v33  ;;  %v1037_v10 = vpop.eup %1036  ;;  %1048 = vpow2.f32 %v620_v44 }
  0x81   : > { %v525_v9 = vsub.f32 %v457_v2, %v524_v5  ;;  %v1039_v41 = vpop.eup %1038  ;;  %v921_v2 = vld [vmem:[%s1274_s29 + $0x60] sm:$0xff]  ;;  %v922_v5 = vld [vmem:[%s1274_s29 + $0x68] sm:$0xff] }
  0x82   : > { %v594_v39 = vadd.f32 %v1035_v13, %v590_v36  ;;  %v1041_v46 = vpop.eup %1040  ;;  %v923_v36 = vld [vmem:[%s1274_s29 + $0x70] sm:$0xff] }
  0x83   : > { %v526_v42 = vmul.f32 %v525_v9, %v525_v9  ;;  %v1043_v50 = vpop.eup %1042 }
  0x84   : > { %v598_v48 = vadd.f32 %v1037_v10, %v594_v39  ;;  %v1045_v52 = vpop.eup %1044 }
  0x85   : > { %v690_v7 = vmul.f32 %v526_v42, %v1389_v53  ;;  %v1047_v56 = vpop.eup %1046 }
  0x86   : > { %v602_v49 = vadd.f32 %v1039_v41, %v598_v48  ;;  %v1049_v61 = vpop.eup %1048  ;;  %v703_v48 = vld [vmem:[#allocation2 + $0x20] sm:$0xff] }
  0x87   : > { %v691_v51 = vadd.f32 %v690_v7, %v689_v45 }
  0x88   : > { %v606_v47 = vadd.f32 %v1041_v46, %v602_v49  ;;  %v712_v49 = vld [vmem:[#allocation2 + $0x28] sm:$0xff] (%p707_p13) }
  0x89   : > { %692 = vst [vmem:[#allocation2 + $0x8] sm:$0xff] %v691_v51  ;;  %713 = vadd.xlane.f32.xlu0 (%p707_p13), %v712_v49  ;;  %v724_v51 = vld [vmem:[#allocation2 + $0x10] sm:$0xff] (%p707_p13) }
  0x8a   : > { %v610_v54 = vadd.f32 %v1043_v50, %v606_v47  ;;  %v748_v50 = vld [vmem:[#allocation2] sm:$0xff] (%p707_p13) }
  0x8c   : > { %v614_v60 = vadd.f32 %v1045_v52, %v610_v54 }
  0x8e   : > { %v618_v0 = vadd.f32 %v1047_v56, %v614_v60 }
  0x90   : > { %v622_v19 = vadd.f32 %v1049_v61, %v618_v0  ;;  %v736_v7 = vld [vmem:[#allocation2 + $0x8] sm:$0xff] (%p707_p13) }
  0x91   : > { %737 = vadd.xlane.f32.xlu1 (%p707_p13), %v736_v7  ;;  %725 = vadd.xlane.f32.xlu0 (%p707_p13), %v724_v51 }
  0x92   : > { %1050 = vlog2.f32 %v622_v19 }
  0x98   : > { %v1051_v57 = vpop.eup %1050 }
  0x99   : > { %v624_v40 = vmul.f32 0.6931472, %v1051_v57  ;;  %749 = vadd.xlane.f32.xlu1 (%p707_p13), %v748_v50 }
  0x9b   : > { %v625_v6 = vadd.f32 %v624_v40, %v1413_v1 }
  0x9d   : > { %v628_v15 = vsub.f32 %v625_v6, %v1315_v58  ;;  %v632_v16 = vsub.f32 %v625_v6, %v1318_v59  ;;  %v637_v63 = vsub.f32 %v625_v6, %v1323_v62  ;;  %v642_v17 = vsub.f32 %v625_v6, %v1332_v3  ;;  %v920_v3 = vld [vmem:[%s1274_s29 + $0x58] sm:$0xff] }
  0x9e   : > { %v647_v1 = vsub.f32 %v625_v6, %v1353_v12  ;;  %v652_v58 = vsub.f32 %v625_v6, %v1366_v22  ;;  %v657_v62 = vsub.f32 %v625_v6, %v1378_v32  ;;  %v662_v31 = vsub.f32 %v625_v6, %v1383_v43 }
  0x9f   : > { %v629_v20 = vmul.f32 %v914_v8, %v628_v15  ;;  %v633_v21 = vmul.f32 %v915_v11, %v632_v16  ;;  %v638_v23 = vmul.f32 %v916_v14, %v637_v63  ;;  %v643_v26 = vmul.f32 %v917_v18, %v642_v17 }
  0xa0   : > { %v648_v28 = vmul.f32 %v918_v24, %v647_v1  ;;  %v653_v30 = vmul.f32 %v919_v27, %v652_v58  ;;  %v658_v33 = vmul.f32 %v920_v3, %v657_v62  ;;  %v667_v13 = vsub.f32 %v625_v6, %v1392_v55 }
  0xa1   : > { %v634_v25 = vadd.f32 %v633_v21, %v629_v20  ;;  %v663_v22 = vmul.f32 %v921_v2, %v662_v31  ;;  %v672_v4 = vsub.f32 %v625_v6, %v1403_v29  ;;  %v677_v32 = vsub.f32 %v625_v6, %v1408_v37  ;;  %v760_v29 = vld [vmem:[#allocation2 + $0x18] sm:$0xff] (%p707_p13) }
  0xa2   : > { %v668_v9 = vmul.f32 %v922_v5, %v667_v13  ;;  %761 = vadd.xlane.f32.xlu2 (%p707_p13), %v760_v29 }
  0xa3   : > { %v639_v59 = vadd.f32 %v638_v23, %v634_v25  ;;  %v673_v41 = vmul.f32 %v923_v36, %v672_v4  ;;  %v678_v43 = vmul.f32 %v924_v38, %v677_v32 }
  0xa5   : > { %v644_v35 = vadd.f32 %v643_v26, %v639_v59 }
  0xa7   : > { %v649_v12 = vadd.f32 %v648_v28, %v644_v35 }
  0xa9   : > { %v654_v34 = vadd.f32 %v653_v30, %v649_v12 }
  0xab   : > { %v659_v10 = vadd.f32 %v658_v33, %v654_v34 }
  0xad   : > { %v664_v39 = vadd.f32 %v663_v22, %v659_v10 }
  0xaf   : > { %v669_v42 = vadd.f32 %v668_v9, %v664_v39 }
  0xb1   : > { %v674_v44 = vadd.f32 %v673_v41, %v669_v42 }
  0xb3   : > { %v679_v45 = vadd.f32 %v678_v43, %v674_v44 }
  0xb5   : > { %v704_v55 = vmul.f32 %v679_v45, %v1389_v53  ;;  %711 = sbr.rel (!%p707_p13) target bundleno = 372 (0x174), region = 120 }
  0xb7   : > { %v705_v46 = vadd.f32 %v704_v55, %v703_v48 }
  0xb9   : > { %706 = vst [vmem:[#allocation2 + $0x20] sm:$0xff] %v705_v46 }
  0xc0   : > { %v772_v37 = vld [vmem:[#allocation2 + $0x20] sm:$0xff] }
  0xc1   : > { %773 = vadd.xlane.f32.xlu2 %v772_v37 }
  0xfc   : > { %v714_v54 = vpop.xlane.xlu0 %713 }
  0xfd   : > { %v715_v56 = vrot.slane %v714_v54, 4 }
  0xff   : > { %v716_v61 = vadd.f32 %v715_v56, %v714_v54 }
 0x101   : > { %v717_v19 = vrot.slane %v716_v61, 2 }
 0x103   : > { %v718_v8 = vadd.f32 %v717_v19, %v716_v61 }
 0x104   : > { %v738_v52 = vpop.xlane.xlu1 %737  ;;  %v726_v16 = vpop.xlane.xlu0 %725 }
 0x105   : > { %v739_v53 = vrot.slane %v738_v52, 4  ;;  %v727_v63 = vrot.slane %v726_v16, 4  ;;  %v719_v17 = vrot.slane %v718_v8, 1 }
 0x107   : > { %v740_v0 = vadd.f32 %v739_v53, %v738_v52  ;;  %v728_v23 = vadd.f32 %v727_v63, %v726_v16  ;;  %v720_v1 = vadd.f32 %v719_v17, %v718_v8 }
 0x109   : > { %v741_v11 = vrot.slane %v740_v0, 2  ;;  %v729_v58 = vrot.slane %v728_v23, 2  ;;  %932 = vpush %v720_v1 }
 0x10b   : > { %v742_v26 = vadd.f32 %v741_v11, %v740_v0  ;;  %v730_v62 = vadd.f32 %v729_v58, %v728_v23 }
 0x10c   : > { %v750_v6 = vpop.xlane.xlu1 %749 }
 0x10d   : > { %v751_v15 = vrot.slane %v750_v6, 4  ;;  %v743_v3 = vrot.slane %v742_v26, 1  ;;  %v731_v30 = vrot.slane %v730_v62, 1 }
 0x10f   : > { %v752_v21 = vadd.f32 %v751_v15, %v750_v6  ;;  %v732_v12 = vadd.f32 %v731_v30, %v730_v62  ;;  %v744_v13 = vadd.f32 %v743_v3, %v742_v26 }
 0x111   : > { %v753_v25 = vrot.slane %v752_v21, 2  ;;  %934 = vpush %v732_v12 }
 0x112   : > { %936 = vpush %v744_v13 }
 0x113   : > { %v754_v59 = vadd.f32 %v753_v25, %v752_v21 }
 0x115   : > { %v762_v47 = vpop.xlane.xlu2 %761  ;;  %v755_v35 = vrot.slane %v754_v59, 1 }
 0x116   : > { %v763_v60 = vrot.slane %v762_v47, 4 }
 0x117   : > { %v756_v33 = vadd.f32 %v755_v35, %v754_v59 }
 0x118   : > { %v764_v57 = vadd.f32 %v763_v60, %v762_v47 }
 0x119   : > { %938 = vpush %v756_v33 }
 0x11a   : > { %v765_v18 = vrot.slane %v764_v57, 2 }
 0x11c   : > { %v766_v28 = vadd.f32 %v765_v18, %v764_v57 }
 0x11e   : > { %v767_v2 = vrot.slane %v766_v28, 1 }
 0x120   : > { %v768_v34 = vadd.f32 %v767_v2, %v766_v28 }
 0x122   : > { %940 = vpush %v768_v34 }
 0x134   : > { %v774_v40 = vpop.xlane.xlu2 %773 }
 0x135   : > { %v775_v14 = vrot.slane %v774_v40, 4 }
 0x137   : > { %v776_v20 = vadd.f32 %v775_v14, %v774_v40 }
 0x139   : > { %v777_v24 = vrot.slane %v776_v20, 2 }
 0x13a   : > { %s933_s14 = spop %932 }
 0x13b   : > { %v778_v27 = vadd.f32 %v777_v24, %v776_v20  ;;  %723 = sst [smem:[#allocation8]] %s933_s14 }
 0x13d   : > { %v779_v31 = vrot.slane %v778_v27, 1 }
 0x13f   : > { %v780_v5 = vadd.f32 %v779_v31, %v778_v27 }
 0x141   : > { %942 = vpush %v780_v5 }
 0x142   : > { %s935_s8 = spop %934 }
 0x143   : > { %735 = sst [smem:[#allocation8 + $0x1]] %s935_s8  ;;  %s937_s9 = spop %936 }
 0x144   : > { %747 = sst [smem:[#allocation8 + $0x2]] %s937_s9 }
 0x14a   : > { %s939_s10 = spop %938 }
 0x14b   : > { %759 = sst [smem:[#allocation8 + $0x3]] %s939_s10 }
 0x153   : > { %s941_s11 = spop %940 }
 0x154   : > { %771 = sst [smem:[#allocation8 + $0x4]] %s941_s11 }
 0x172   : > { %s943_s19 = spop %942 }
 0x173   : > { %783 = sst [smem:[#allocation8 + $0x5]] %s943_s19 }
 0x174 PF: > { %p958_p0 = scmp.eq.s32.totalorder %s878_s17, 2  ;;  %s790_s20 = sshll.u32 %s1492_s3, 4  ;;  %s791_s20 = int_to_ptr.vmem [resolvable:$true] %s790_s20 }
 0x175   : > { %s1132_s26 = smov [#allocation8]  }
 0x176   : > { %949 = dma.smem_to_vmem (%p958_p0), %s1132_s26, 16, %s791_s20, [#allocation5]  }
 0x177   : > { %1106 = dma.done.wait (%p958_p0), [#allocation5], 16  }
 0x178   : > { %1108 = vsyncadd (%p958_p0), [#allocation5], 4294967280 }
 0x179   : > { %799 = sfence }
 0x17a PF: > { %s15_s16 = sadd.s32 1, %s1127_s16   ;;  %s1496_s12 = smov %s1115_s13 }
 0x17b   : > { %p12_p1 = scmp.ge.s32.totalorder %s15_s16, 5   ;;  %s1497_s13 = smov %s1205_s24 }
 0x17c   : > { %s1498_s14 = smov %s1123_s15  ;;  %s1499_s15 = smov %s1501_s18 }
 0x17d   :  { %14 = sbr.rel (!%p12_p1) target bundleno = 4 (0x4), region = 202 }
 0x182   :  { %805 = vsyncpa [#allocation4], 1 }
 0x183   :  { %807 = vsyncpa [#allocation4 + $0x1], 1 }
 0x184   :  { %808 = vsyncpa [#allocation5], 1 }
 0x185   :  { %810 = vsyncpa [#allocation5 + $0x1], 1 }

</bundles_post_ra>
